<compile_context>
chip_gen: v7x
topology: tpu7x:2x2x1
jax: 0.10.0
libtpu: 0.0.40
codegen_flags: <defaults>
</compile_context>

<pallas_src>
import functools
import math

import numpy as np
import jax
import jax.numpy as jnp
from jax.experimental import pallas as pl
from jax.experimental.pallas import tpu as pltpu


# ----------------------------------------------------------------------------- config
VISION_HIDDEN = 48          # config.vision_config.hidden_size
TEXT_HIDDEN = 32            # config.text_config.hidden_size
TEXT_INTERMEDIATE = 64      # config.text_config.intermediate_size (modality projection)
N_HEADS = 4                 # perceiver_config.resampler_n_heads
HEAD_DIM = 8                # perceiver_config.resampler_head_dim
N_KV_HEADS = 2              # perceiver_config.num_key_value_heads
N_REP = N_HEADS // N_KV_HEADS
N_LATENTS = 8               # perceiver_config.resampler_n_latents
DEPTH = 2                   # perceiver_config.resampler_depth
RMS_EPS = 1e-6
PATCH_SIZE = 4              # config.vision_config.patch_size
IMG_SIZE = 16
VOCAB = 64
IMAGE_TOKEN_ID = 63
DTYPE = jnp.float32

NQ = N_HEADS * HEAD_DIM           # 32
NKV = N_KV_HEADS * HEAD_DIM       # 16
QKV_OUT = NQ + 2 * NKV            # 64  (fused q|k|v projection width)
MLP_HID = 4 * TEXT_HIDDEN         # 128 (perceiver MLP intermediate)
MP_HID = TEXT_INTERMEDIATE        # 64  (modality projection intermediate)
NEG_INF = -1e30


# ----------------------------------------------------------------------------- in-kernel helpers
def _bf16_dot(a, b):
    """a @ b with bf16 operands, f32 MXU accumulation."""
    return jnp.dot(a.astype(jnp.bfloat16), b.astype(jnp.bfloat16),
                   preferred_element_type=jnp.float32)


def _bf16_dot_nt(a, b):
    """a @ b.T without materializing the transpose (contract last dims)."""
    return jax.lax.dot_general(
        a.astype(jnp.bfloat16), b.astype(jnp.bfloat16),
        dimension_numbers=(((1,), (1,)), ((), ())),
        preferred_element_type=jnp.float32)


def _rms(x, w, eps=RMS_EPS):
    x = x.astype(jnp.float32)
    var = jnp.mean(x * x, axis=-1, keepdims=True)
    return x * jax.lax.rsqrt(var + eps) * w.astype(jnp.float32)


def _silu(x):
    return x * jax.nn.sigmoid(x)


# ----------------------------------------------------------------------------- fused connector kernel
def _connector_kernel(ctx_ref, mask_ref,
                      mp_w1_ref, mp_wd_ref, latents_ref,
                      ln_lat_ref, ln_ctx_ref, ln_post_ref,
                      wqkv_ref, wo_ref, mlp_w1_ref, mlp_wd_ref,
                      final_norm_ref, o_ref):
    """One grid step = one image. Everything stays in VMEM/vregs."""
    S = ctx_ref.shape[1]                                        # patches per image
    Lkv = S + N_LATENTS
    scale = 1.0 / math.sqrt(HEAD_DIM)

    # ---- modality projection: down( silu(x@Wg) * (x@Wu) ), gate|up fused ----
    x = ctx_ref[0].astype(jnp.float32)                          # (S, Hv)
    h1 = _bf16_dot(x, mp_w1_ref[...])                           # (S, 2*MP_HID)
    ctx = _bf16_dot(_silu(h1[:, :MP_HID]) * h1[:, MP_HID:],
                    mp_wd_ref[...])                             # (S, TEXT_HIDDEN), f32

    # ---- additive attention bias over kv = [context, latents] (built in-kernel) ----
    bias = jnp.where(mask_ref[0] > 0.5, 0.0, NEG_INF)           # (1, Lkv)
    bias = bias.astype(jnp.float32)

    latents = latents_ref[...].astype(jnp.float32)              # (Lq, TEXT_HIDDEN)

    for d in range(DEPTH):                                      # static unroll, DEPTH=2
        # -- pre-attention norms
        lat_n = _rms(latents, ln_lat_ref[d])                    # (Lq, H)
        ctx_n = _rms(ctx, ln_ctx_ref[d])                        # (S, H)
        hidden = jnp.concatenate([ctx_n, lat_n], axis=0)        # (Lkv, H)

        # -- fused Q|K|V projection: one MXU pass, 64-wide output
        qkv = _bf16_dot(hidden, wqkv_ref[d])                    # (Lkv, QKV_OUT)
        q = qkv[S:, :NQ]                                        # (Lq, NQ)   (q only on latents)
        k = qkv[:, NQ:NQ + NKV]                                 # (Lkv, NKV)
        v = qkv[:, NQ + NKV:]                                   # (Lkv, NKV)

        # -- multi-head cross attention; repeat_kv folded via kv-head index,
        #    o_proj folded into the per-head loop (sum of per-head partial products)
        wo_d = wo_ref[d]                                        # (NQ, TEXT_HIDDEN)
        attn_out = jnp.zeros((N_LATENTS, TEXT_HIDDEN), jnp.float32)
        for h in range(N_HEADS):
            kvh = h // N_REP
            qh = q[:, h * HEAD_DIM:(h + 1) * HEAD_DIM]          # (Lq, D)
            kh = k[:, kvh * HEAD_DIM:(kvh + 1) * HEAD_DIM]      # (Lkv, D)
            vh = v[:, kvh * HEAD_DIM:(kvh + 1) * HEAD_DIM]      # (Lkv, D)
            s = _bf16_dot_nt(qh, kh) * scale + bias             # (Lq, Lkv)
            s = s - jnp.max(s, axis=-1, keepdims=True)
            p = jnp.exp(s)
            p = p * pl.reciprocal(jnp.sum(p, axis=-1, keepdims=True), approx=False)
            head = _bf16_dot(p, vh)                             # (Lq, D)
            attn_out = attn_out + _bf16_dot(
                head, wo_d[h * HEAD_DIM:(h + 1) * HEAD_DIM, :])
        latents = latents + attn_out                            # residual

        # -- post-attention gated MLP (gate|up fused), silu
        hpost = _rms(latents, ln_post_ref[d])                   # (Lq, H)
        h1 = _bf16_dot(hpost, mlp_w1_ref[d])                    # (Lq, 2*MLP_HID)
        mlp_out = _bf16_dot(_silu(h1[:, :MLP_HID]) * h1[:, MLP_HID:],
                            mlp_wd_ref[d])                      # (Lq, H)
        latents = latents + mlp_out                             # residual

    out = _rms(latents, final_norm_ref[...])
    o_ref[0] = out.astype(o_ref.dtype)


def connector_fused(image_hidden_states, patch_attention_mask, params):
    """Idefics2Connector.forward (modality projection + perceiver resampler), fused."""
    B, S, Hv = image_hidden_states.shape
    r = params["resampler"]

    # kv mask = [patch mask, ones for latents] — (B, 1, S + N_LATENTS) row mask.
    full_mask = jnp.concatenate(
        [patch_attention_mask.astype(jnp.float32),
         jnp.ones((B, N_LATENTS), jnp.float32)], axis=-1)[:, None, :]

    def whole(arr):
        shape = arr.shape
        return pl.BlockSpec(shape, lambda b, _s=shape: (0,) * len(_s))

    out = pl.pallas_call(
        _connector_kernel,
        out_shape=jax.ShapeDtypeStruct((B, N_LATENTS, TEXT_HIDDEN), DTYPE),
        grid=(B,),
        in_specs=[
            pl.BlockSpec((1, S, Hv), lambda b: (b, 0, 0)),                 # context
            pl.BlockSpec((1, 1, S + N_LATENTS), lambda b: (b, 0, 0)),      # kv row mask
            whole(params["mp_w1"]), whole(params["mp_wd"]),
            whole(r["latents"]),
            whole(r["ln_lat"]), whole(r["ln_ctx"]), whole(r["ln_post"]),
            whole(r["wqkv"]), whole(r["wo"]),
            whole(r["mlp_w1"]), whole(r["mlp_wd"]),
            whole(r["final_norm"]),
        ],
        out_specs=pl.BlockSpec((1, N_LATENTS, TEXT_HIDDEN), lambda b: (b, 0, 0)),
        compiler_params=pltpu.CompilerParams(
            dimension_semantics=("parallel",)),
    )(image_hidden_states, full_mask,
      params["mp_w1"], params["mp_wd"], r["latents"],
      r["ln_lat"], r["ln_ctx"], r["ln_post"],
      r["wqkv"], r["wo"], r["mlp_w1"], r["mlp_wd"], r["final_norm"])
    return out


# ----------------------------------------------------------------------------- glue (plain JAX, jitted)
def inputs_merger(input_ids, inputs_embeds, image_hidden_states):
    """Scatter image hidden states into embed rows where input_ids == image_token_id."""
    H = image_hidden_states.shape[-1]
    flat_mask = (input_ids.reshape(-1) == IMAGE_TOKEN_ID)
    img_flat = image_hidden_states.reshape(-1, H)
    idx = jnp.cumsum(flat_mask.astype(jnp.int32)) - 1
    idx = jnp.clip(idx, 0, img_flat.shape[0] - 1)
    gathered = jnp.take(img_flat, idx, axis=0)
    flat_embeds = inputs_embeds.reshape(-1, H)
    # out-of-range gather rows are masked by the where — keep this invariant.
    merged = jnp.where(flat_mask[:, None], gathered, flat_embeds)
    return merged.reshape(inputs_embeds.shape)


@jax.jit
def _connector_and_merge(input_ids, image_hidden_states, patch_attention_mask, params):
    image_hidden_states = connector_fused(image_hidden_states, patch_attention_mask, params)
    inputs_embeds = jnp.take(params["embed_tokens"], input_ids, axis=0)
    return inputs_merger(input_ids, inputs_embeds, image_hidden_states)


def idefics2_forward(input_ids, pixel_values_np, vision_last_hidden_state, params):
    """Idefics2Model.forward (image branch).

    pixel_values_np is host-side numpy (NCHW) used only for the real-image filter and
    the patch attention mask (dynamic shapes), exactly as in the reference forward.
    """
    nb_values_per_image = int(np.prod(pixel_values_np.shape[1:]))
    real_images_inds = (pixel_values_np == 0.0).reshape(
        pixel_values_np.shape[0], -1).sum(axis=-1) != nb_values_per_image
    pixel_values_np = pixel_values_np[real_images_inds]
    n_real, _, Himg, Wimg = pixel_values_np.shape
    pixel_attention_mask = np.ones((n_real, Himg, Wimg), dtype=bool)
    nph, npw = Himg // PATCH_SIZE, Wimg // PATCH_SIZE
    subgrid = pixel_attention_mask.reshape(n_real, nph, PATCH_SIZE, npw, PATCH_SIZE)
    patch_attention_mask = (subgrid.sum(axis=(2, 4)) > 0).reshape(n_real, -1)
    patch_attention_mask = jnp.asarray(patch_attention_mask)

    # TODO(synk): SiglipVisionModel not provided; `vision_last_hidden_state` stands in for
    # vision_model(pixel_values).last_hidden_state.
    image_hidden_states = vision_last_hidden_state[:n_real]

    hidden_states = _connector_and_merge(
        input_ids, image_hidden_states, patch_attention_mask, params)

    # TODO(synk): LlamaModel (text_model) decoder stack not provided; return merged embeds.
    return hidden_states


# ----------------------------------------------------------------------------- params
def init_params(key):
    """PyTorch-style (out, in) weights, pre-transposed/fused ONCE (no per-forward .T)."""
    def w(key, out_dim, in_dim, scale=0.02):
        return (scale * jax.random.normal(key, (out_dim, in_dim))).astype(DTYPE)

    keys = iter(jax.random.split(key, 64))

    # stacked per-layer weights (DEPTH leading axis), stored (in, out)
    ln_lat, ln_ctx, ln_post = [], [], []
    wqkv, wo, mlp_w1, mlp_wd = [], [], [], []
    for _ in range(DEPTH):
        ln_lat.append(jnp.ones((1, TEXT_HIDDEN), DTYPE))
        ln_ctx.append(jnp.ones((1, TEXT_HIDDEN), DTYPE))
        ln_post.append(jnp.ones((1, TEXT_HIDDEN), DTYPE))
        wq = w(next(keys), NQ, TEXT_HIDDEN)
        wk = w(next(keys), NKV, TEXT_HIDDEN)
        wv = w(next(keys), NKV, TEXT_HIDDEN)
        wqkv.append(jnp.concatenate([wq.T, wk.T, wv.T], axis=-1))      # (H, NQ+2*NKV)
        wo.append(w(next(keys), TEXT_HIDDEN, NQ).T)                    # (NQ, H)
        wg = w(next(keys), MLP_HID, TEXT_HIDDEN)
        wu = w(next(keys), MLP_HID, TEXT_HIDDEN)
        mlp_w1.append(jnp.concatenate([wg.T, wu.T], axis=-1))          # (H, 2*MLP_HID)
        mlp_wd.append(w(next(keys), TEXT_HIDDEN, MLP_HID).T)           # (MLP_HID, H)

    mp_wg = w(next(keys), MP_HID, VISION_HIDDEN)
    mp_wu = w(next(keys), MP_HID, VISION_HIDDEN)
    mp_wd = w(next(keys), TEXT_HIDDEN, MP_HID)

    return dict(
        mp_w1=jnp.concatenate([mp_wg.T, mp_wu.T], axis=-1),            # (Hv, 2*MP_HID)
        mp_wd=mp_wd.T,                                                 # (MP_HID, H)
        resampler=dict(
            latents=jnp.ones((N_LATENTS, TEXT_HIDDEN), DTYPE),         # torch.ones init
            ln_lat=jnp.stack(ln_lat), ln_ctx=jnp.stack(ln_ctx), ln_post=jnp.stack(ln_post),
            wqkv=jnp.stack(wqkv), wo=jnp.stack(wo),
            mlp_w1=jnp.stack(mlp_w1), mlp_wd=jnp.stack(mlp_wd),
            final_norm=jnp.ones((1, TEXT_HIDDEN), DTYPE),
        ),
        embed_tokens=(0.02 * jax.random.normal(next(keys), (VOCAB, TEXT_HIDDEN))).astype(DTYPE),
    )


# ----------------------------------------------------------------------------- main
if __name__ == "__main__":
    key = jax.random.PRNGKey(0)
    k_par, k_pix, k_vis = jax.random.split(key, 3)

    params = init_params(k_par)

    # pixel_values: NCHW, 3 candidate images, image #1 is all zeros -> filtered out.
    pv = jax.random.normal(k_pix, (3, 3, IMG_SIZE, IMG_SIZE), dtype=jnp.float32)
    pv = pv.at[1].set(0.0)
    pixel_values_np = np.asarray(pv)

    num_patches = (IMG_SIZE // PATCH_SIZE) ** 2  # 16
    # Stand-in for SiglipVisionModel output (see TODO): (num_real_images, patches, Cv)
    vision_last_hidden_state = jax.random.normal(
        k_vis, (2, num_patches, VISION_HIDDEN), dtype=DTYPE)

    # 2 real images * N_LATENTS image tokens each = 16 image tokens in the sequence.
    ids = [1, 2, 3] + [IMAGE_TOKEN_ID] * N_LATENTS + [4, 5] + \
          [IMAGE_TOKEN_ID] * N_LATENTS + [6, 7, 8]
    input_ids = jnp.asarray(ids, dtype=jnp.int32)

    out = idefics2_forward(input_ids, pixel_values_np, vision_last_hidden_state, params)
    out = jax.block_until_ready(out)
    assert out.shape == (len(ids), TEXT_HIDDEN)
    assert bool(jnp.all(jnp.isfinite(out)))
    print("KERNEL_OK")
</pallas_src>

<mosaic_0001>
module attributes {stable_mosaic.version = 11 : i64} {
  func.func @_connector_kernel(%arg0: i32, %arg1: memref<1x16x48xf32, #tpu.memory_space<vmem>>, %arg2: memref<1x1x24xf32, #tpu.memory_space<vmem>>, %arg3: memref<48x128xf32, #tpu.memory_space<vmem>>, %arg4: memref<64x32xf32, #tpu.memory_space<vmem>>, %arg5: memref<8x32xf32, #tpu.memory_space<vmem>>, %arg6: memref<2x1x32xf32, #tpu.memory_space<vmem>>, %arg7: memref<2x1x32xf32, #tpu.memory_space<vmem>>, %arg8: memref<2x1x32xf32, #tpu.memory_space<vmem>>, %arg9: memref<2x32x64xf32, #tpu.memory_space<vmem>>, %arg10: memref<2x32x32xf32, #tpu.memory_space<vmem>>, %arg11: memref<2x32x256xf32, #tpu.memory_space<vmem>>, %arg12: memref<2x128x32xf32, #tpu.memory_space<vmem>>, %arg13: memref<1x32xf32, #tpu.memory_space<vmem>>, %arg14: memref<1x8x32xf32, #tpu.memory_space<vmem>>) attributes {dimension_semantics = [#tpu.dimension_semantics<parallel>], iteration_bounds = array<i64: 2>, scalar_prefetch = 0 : i64, scratch_operands = 0 : i64, tpu.core_type = #tpu.core_type<tc>, window_params = [{transform_indices = @transform_0, window_bounds = array<i64: 1, 16, 48>}, {transform_indices = @transform_1, window_bounds = array<i64: 1, 1, 24>}, {pipeline_mode = #tpu.pipeline_mode<synchronous>, transform_indices = @transform_2, window_bounds = array<i64: 48, 128>}, {pipeline_mode = #tpu.pipeline_mode<synchronous>, transform_indices = @transform_3, window_bounds = array<i64: 64, 32>}, {pipeline_mode = #tpu.pipeline_mode<synchronous>, transform_indices = @transform_4, window_bounds = array<i64: 8, 32>}, {pipeline_mode = #tpu.pipeline_mode<synchronous>, transform_indices = @transform_5, window_bounds = array<i64: 2, 1, 32>}, {pipeline_mode = #tpu.pipeline_mode<synchronous>, transform_indices = @transform_6, window_bounds = array<i64: 2, 1, 32>}, {pipeline_mode = #tpu.pipeline_mode<synchronous>, transform_indices = @transform_7, window_bounds = array<i64: 2, 1, 32>}, {pipeline_mode = #tpu.pipeline_mode<synchronous>, transform_indices = @transform_8, window_bounds = array<i64: 2, 32, 64>}, {pipeline_mode = #tpu.pipeline_mode<synchronous>, transform_indices = @transform_9, window_bounds = array<i64: 2, 32, 32>}, {pipeline_mode = #tpu.pipeline_mode<synchronous>, transform_indices = @transform_10, window_bounds = array<i64: 2, 32, 256>}, {pipeline_mode = #tpu.pipeline_mode<synchronous>, transform_indices = @transform_11, window_bounds = array<i64: 2, 128, 32>}, {pipeline_mode = #tpu.pipeline_mode<synchronous>, transform_indices = @transform_12, window_bounds = array<i64: 1, 32>}, {transform_indices = @transform_13, window_bounds = array<i64: 1, 8, 32>}]} {
    %c0 = arith.constant 0 : index
    %c0_0 = arith.constant 0 : index
    %c0_1 = arith.constant 0 : index
    %0 = vector.load %arg1[%c0, %c0_0, %c0_1] : memref<1x16x48xf32, #tpu.memory_space<vmem>>, vector<1x16x48xf32>
    %1 = vector.shape_cast %0 : vector<1x16x48xf32> to vector<16x48xf32>
    %c0_2 = arith.constant 0 : index
    %c0_3 = arith.constant 0 : index
    %2 = vector.load %arg3[%c0_2, %c0_3] : memref<48x128xf32, #tpu.memory_space<vmem>>, vector<48x128xf32>
    %3 = arith.truncf %1 : vector<16x48xf32> to vector<16x48xbf16>
    %4 = arith.truncf %2 : vector<48x128xf32> to vector<48x128xbf16>
    %cst = arith.constant dense<0.000000e+00> : vector<16x128xf32>
    %5 = tpu.matmul %3, %4, %cst {dimension_numbers = #tpu.dot_dimension_numbers<[1], [0], [0], [1], [0, 0, 1, 1], [], []>} : vector<16x48xbf16>, vector<48x128xbf16>, vector<16x128xf32> -> vector<16x128xf32>
    %6 = vector.extract_strided_slice %5 {offsets = [0, 0], sizes = [16, 64], strides = [1, 1]} : vector<16x128xf32> to vector<16x64xf32>
    %7 = arith.negf %6 : vector<16x64xf32>
    %8 = math.exp %7 : vector<16x64xf32>
    %cst_4 = arith.constant 1.000000e+00 : f32
    %9 = vector.broadcast %cst_4 : f32 to vector<16x64xf32>
    %10 = arith.addf %9, %8 : vector<16x64xf32>
    %11 = arith.divf %9, %10 : vector<16x64xf32>
    %12 = arith.mulf %6, %11 : vector<16x64xf32>
    %13 = vector.extract_strided_slice %5 {offsets = [0, 64], sizes = [16, 64], strides = [1, 1]} : vector<16x128xf32> to vector<16x64xf32>
    %14 = arith.mulf %12, %13 : vector<16x64xf32>
    %c0_5 = arith.constant 0 : index
    %c0_6 = arith.constant 0 : index
    %15 = vector.load %arg4[%c0_5, %c0_6] : memref<64x32xf32, #tpu.memory_space<vmem>>, vector<64x32xf32>
    %16 = arith.truncf %14 : vector<16x64xf32> to vector<16x64xbf16>
    %17 = arith.truncf %15 : vector<64x32xf32> to vector<64x32xbf16>
    %cst_7 = arith.constant dense<0.000000e+00> : vector<16x32xf32>
    %18 = tpu.matmul %16, %17, %cst_7 {dimension_numbers = #tpu.dot_dimension_numbers<[1], [0], [0], [1], [0, 0, 1, 1], [], []>} : vector<16x64xbf16>, vector<64x32xbf16>, vector<16x32xf32> -> vector<16x32xf32>
    %c0_8 = arith.constant 0 : index
    %c0_9 = arith.constant 0 : index
    %c0_10 = arith.constant 0 : index
    %19 = vector.load %arg2[%c0_8, %c0_9, %c0_10] : memref<1x1x24xf32, #tpu.memory_space<vmem>>, vector<1x1x24xf32>
    %20 = vector.shape_cast %19 : vector<1x1x24xf32> to vector<1x24xf32>
    %cst_11 = arith.constant 5.000000e-01 : f32
    %21 = vector.broadcast %cst_11 : f32 to vector<1x24xf32>
    %22 = arith.cmpf ogt, %20, %21 : vector<1x24xf32>
    %cst_12 = arith.constant 0.000000e+00 : f32
    %cst_13 = arith.constant -1.000000e+30 : f32
    %23 = vector.broadcast %cst_12 : f32 to vector<1x24xf32>
    %24 = vector.broadcast %cst_13 : f32 to vector<1x24xf32>
    %25 = arith.select %22, %23, %24 : vector<1x24xi1>, vector<1x24xf32>
    %c0_14 = arith.constant 0 : index
    %c0_15 = arith.constant 0 : index
    %26 = vector.load %arg5[%c0_14, %c0_15] : memref<8x32xf32, #tpu.memory_space<vmem>>, vector<8x32xf32>
    %c0_16 = arith.constant 0 : index
    %c0_17 = arith.constant 0 : index
    %c0_18 = arith.constant 0 : index
    %27 = vector.load %arg6[%c0_16, %c0_17, %c0_18] : memref<2x1x32xf32, #tpu.memory_space<vmem>>, vector<1x1x32xf32>
    %28 = vector.shape_cast %27 : vector<1x1x32xf32> to vector<1x32xf32>
    %29 = arith.mulf %26, %26 : vector<8x32xf32>
    %cst_19 = arith.constant dense<0.000000e+00> : vector<8xf32>
    %30 = vector.multi_reduction <add>, %29, %cst_19 [1] : vector<8x32xf32> to vector<8xf32>
    %31 = vector.shape_cast %30 : vector<8xf32> to vector<8x1xf32>
    %cst_20 = arith.constant 3.200000e+01 : f32
    %32 = vector.broadcast %cst_20 : f32 to vector<8x1xf32>
    %33 = arith.divf %31, %32 : vector<8x1xf32>
    %cst_21 = arith.constant 9.99999997E-7 : f32
    %34 = vector.broadcast %cst_21 : f32 to vector<8x1xf32>
    %35 = arith.addf %33, %34 : vector<8x1xf32>
    %36 = math.rsqrt %35 : vector<8x1xf32>
    %37 = vector.broadcast %36 : vector<8x1xf32> to vector<8x32xf32>
    %38 = arith.mulf %26, %37 : vector<8x32xf32>
    %39 = vector.broadcast %28 : vector<1x32xf32> to vector<8x32xf32>
    %40 = arith.mulf %38, %39 : vector<8x32xf32>
    %c0_22 = arith.constant 0 : index
    %c0_23 = arith.constant 0 : index
    %c0_24 = arith.constant 0 : index
    %41 = vector.load %arg7[%c0_22, %c0_23, %c0_24] : memref<2x1x32xf32, #tpu.memory_space<vmem>>, vector<1x1x32xf32>
    %42 = vector.shape_cast %41 : vector<1x1x32xf32> to vector<1x32xf32>
    %43 = arith.mulf %18, %18 : vector<16x32xf32>
    %cst_25 = arith.constant dense<0.000000e+00> : vector<16xf32>
    %44 = vector.multi_reduction <add>, %43, %cst_25 [1] : vector<16x32xf32> to vector<16xf32>
    %45 = vector.shape_cast %44 : vector<16xf32> to vector<16x1xf32>
    %cst_26 = arith.constant 3.200000e+01 : f32
    %46 = vector.broadcast %cst_26 : f32 to vector<16x1xf32>
    %47 = arith.divf %45, %46 : vector<16x1xf32>
    %cst_27 = arith.constant 9.99999997E-7 : f32
    %48 = vector.broadcast %cst_27 : f32 to vector<16x1xf32>
    %49 = arith.addf %47, %48 : vector<16x1xf32>
    %50 = math.rsqrt %49 : vector<16x1xf32>
    %51 = vector.broadcast %50 : vector<16x1xf32> to vector<16x32xf32>
    %52 = arith.mulf %18, %51 : vector<16x32xf32>
    %53 = vector.broadcast %42 : vector<1x32xf32> to vector<16x32xf32>
    %54 = arith.mulf %52, %53 : vector<16x32xf32>
    %55 = tpu.concatenate %54, %40 in 0 : vector<16x32xf32>, vector<8x32xf32> -> vector<24x32xf32>
    %c0_28 = arith.constant 0 : index
    %c0_29 = arith.constant 0 : index
    %c0_30 = arith.constant 0 : index
    %56 = vector.load %arg9[%c0_28, %c0_29, %c0_30] : memref<2x32x64xf32, #tpu.memory_space<vmem>>, vector<1x32x64xf32>
    %57 = vector.shape_cast %56 : vector<1x32x64xf32> to vector<32x64xf32>
    %58 = arith.truncf %55 : vector<24x32xf32> to vector<24x32xbf16>
    %59 = arith.truncf %57 : vector<32x64xf32> to vector<32x64xbf16>
    %cst_31 = arith.constant dense<0.000000e+00> : vector<24x64xf32>
    %60 = tpu.matmul %58, %59, %cst_31 {dimension_numbers = #tpu.dot_dimension_numbers<[1], [0], [0], [1], [0, 0, 1, 1], [], []>} : vector<24x32xbf16>, vector<32x64xbf16>, vector<24x64xf32> -> vector<24x64xf32>
    %61 = vector.extract_strided_slice %60 {offsets = [16, 0], sizes = [8, 32], strides = [1, 1]} : vector<24x64xf32> to vector<8x32xf32>
    %62 = vector.extract_strided_slice %60 {offsets = [0, 32], sizes = [24, 16], strides = [1, 1]} : vector<24x64xf32> to vector<24x16xf32>
    %63 = vector.extract_strided_slice %60 {offsets = [0, 48], sizes = [24, 16], strides = [1, 1]} : vector<24x64xf32> to vector<24x16xf32>
    %c0_32 = arith.constant 0 : index
    %c0_33 = arith.constant 0 : index
    %c0_34 = arith.constant 0 : index
    %64 = vector.load %arg10[%c0_32, %c0_33, %c0_34] : memref<2x32x32xf32, #tpu.memory_space<vmem>>, vector<1x32x32xf32>
    %65 = vector.shape_cast %64 : vector<1x32x32xf32> to vector<32x32xf32>
    %cst_35 = arith.constant 0.000000e+00 : f32
    %66 = vector.broadcast %cst_35 : f32 to vector<8x32xf32>
    %67 = vector.extract_strided_slice %61 {offsets = [0, 0], sizes = [8, 8], strides = [1, 1]} : vector<8x32xf32> to vector<8x8xf32>
    %68 = vector.extract_strided_slice %62 {offsets = [0, 0], sizes = [24, 8], strides = [1, 1]} : vector<24x16xf32> to vector<24x8xf32>
    %69 = vector.extract_strided_slice %63 {offsets = [0, 0], sizes = [24, 8], strides = [1, 1]} : vector<24x16xf32> to vector<24x8xf32>
    %70 = arith.truncf %67 : vector<8x8xf32> to vector<8x8xbf16>
    %71 = arith.truncf %68 : vector<24x8xf32> to vector<24x8xbf16>
    %cst_36 = arith.constant dense<0.000000e+00> : vector<8x24xf32>
    %72 = tpu.matmul %70, %71, %cst_36 {dimension_numbers = #tpu.dot_dimension_numbers<[1], [1], [0], [0], [0, 0, 1, 0], [], []>} : vector<8x8xbf16>, vector<24x8xbf16>, vector<8x24xf32> -> vector<8x24xf32>
    %cst_37 = arith.constant 0.353553385 : f32
    %73 = vector.broadcast %cst_37 : f32 to vector<8x24xf32>
    %74 = arith.mulf %72, %73 : vector<8x24xf32>
    %75 = vector.broadcast %25 : vector<1x24xf32> to vector<8x24xf32>
    %76 = arith.addf %74, %75 : vector<8x24xf32>
    %cst_38 = arith.constant dense<0xFF800000> : vector<8xf32>
    %77 = vector.multi_reduction <maximumf>, %76, %cst_38 [1] : vector<8x24xf32> to vector<8xf32>
    %78 = vector.shape_cast %77 : vector<8xf32> to vector<8x1xf32>
    %79 = vector.broadcast %78 : vector<8x1xf32> to vector<8x24xf32>
    %80 = arith.subf %76, %79 : vector<8x24xf32>
    %81 = math.exp %80 : vector<8x24xf32>
    %cst_39 = arith.constant dense<0.000000e+00> : vector<8xf32>
    %82 = vector.multi_reduction <add>, %81, %cst_39 [1] : vector<8x24xf32> to vector<8xf32>
    %83 = vector.shape_cast %82 : vector<8xf32> to vector<8x1xf32>
    %84 = tpu.reciprocal %83 : vector<8x1xf32> -> vector<8x1xf32>
    %85 = vector.broadcast %84 : vector<8x1xf32> to vector<8x24xf32>
    %86 = arith.mulf %81, %85 : vector<8x24xf32>
    %87 = arith.truncf %86 : vector<8x24xf32> to vector<8x24xbf16>
    %88 = arith.truncf %69 : vector<24x8xf32> to vector<24x8xbf16>
    %cst_40 = arith.constant dense<0.000000e+00> : vector<8x8xf32>
    %89 = tpu.matmul %87, %88, %cst_40 {dimension_numbers = #tpu.dot_dimension_numbers<[1], [0], [0], [1], [0, 0, 1, 1], [], []>} : vector<8x24xbf16>, vector<24x8xbf16>, vector<8x8xf32> -> vector<8x8xf32>
    %90 = vector.extract_strided_slice %65 {offsets = [0, 0], sizes = [8, 32], strides = [1, 1]} : vector<32x32xf32> to vector<8x32xf32>
    %91 = arith.truncf %89 : vector<8x8xf32> to vector<8x8xbf16>
    %92 = arith.truncf %90 : vector<8x32xf32> to vector<8x32xbf16>
    %cst_41 = arith.constant dense<0.000000e+00> : vector<8x32xf32>
    %93 = tpu.matmul %91, %92, %cst_41 {dimension_numbers = #tpu.dot_dimension_numbers<[1], [0], [0], [1], [0, 0, 1, 1], [], []>} : vector<8x8xbf16>, vector<8x32xbf16>, vector<8x32xf32> -> vector<8x32xf32>
    %94 = arith.addf %66, %93 : vector<8x32xf32>
    %95 = vector.extract_strided_slice %61 {offsets = [0, 8], sizes = [8, 8], strides = [1, 1]} : vector<8x32xf32> to vector<8x8xf32>
    %96 = vector.extract_strided_slice %62 {offsets = [0, 0], sizes = [24, 8], strides = [1, 1]} : vector<24x16xf32> to vector<24x8xf32>
    %97 = vector.extract_strided_slice %63 {offsets = [0, 0], sizes = [24, 8], strides = [1, 1]} : vector<24x16xf32> to vector<24x8xf32>
    %98 = arith.truncf %95 : vector<8x8xf32> to vector<8x8xbf16>
    %99 = arith.truncf %96 : vector<24x8xf32> to vector<24x8xbf16>
    %cst_42 = arith.constant dense<0.000000e+00> : vector<8x24xf32>
    %100 = tpu.matmul %98, %99, %cst_42 {dimension_numbers = #tpu.dot_dimension_numbers<[1], [1], [0], [0], [0, 0, 1, 0], [], []>} : vector<8x8xbf16>, vector<24x8xbf16>, vector<8x24xf32> -> vector<8x24xf32>
    %cst_43 = arith.constant 0.353553385 : f32
    %101 = vector.broadcast %cst_43 : f32 to vector<8x24xf32>
    %102 = arith.mulf %100, %101 : vector<8x24xf32>
    %103 = vector.broadcast %25 : vector<1x24xf32> to vector<8x24xf32>
    %104 = arith.addf %102, %103 : vector<8x24xf32>
    %cst_44 = arith.constant dense<0xFF800000> : vector<8xf32>
    %105 = vector.multi_reduction <maximumf>, %104, %cst_44 [1] : vector<8x24xf32> to vector<8xf32>
    %106 = vector.shape_cast %105 : vector<8xf32> to vector<8x1xf32>
    %107 = vector.broadcast %106 : vector<8x1xf32> to vector<8x24xf32>
    %108 = arith.subf %104, %107 : vector<8x24xf32>
    %109 = math.exp %108 : vector<8x24xf32>
    %cst_45 = arith.constant dense<0.000000e+00> : vector<8xf32>
    %110 = vector.multi_reduction <add>, %109, %cst_45 [1] : vector<8x24xf32> to vector<8xf32>
    %111 = vector.shape_cast %110 : vector<8xf32> to vector<8x1xf32>
    %112 = tpu.reciprocal %111 : vector<8x1xf32> -> vector<8x1xf32>
    %113 = vector.broadcast %112 : vector<8x1xf32> to vector<8x24xf32>
    %114 = arith.mulf %109, %113 : vector<8x24xf32>
    %115 = arith.truncf %114 : vector<8x24xf32> to vector<8x24xbf16>
    %116 = arith.truncf %97 : vector<24x8xf32> to vector<24x8xbf16>
    %cst_46 = arith.constant dense<0.000000e+00> : vector<8x8xf32>
    %117 = tpu.matmul %115, %116, %cst_46 {dimension_numbers = #tpu.dot_dimension_numbers<[1], [0], [0], [1], [0, 0, 1, 1], [], []>} : vector<8x24xbf16>, vector<24x8xbf16>, vector<8x8xf32> -> vector<8x8xf32>
    %118 = vector.extract_strided_slice %65 {offsets = [8, 0], sizes = [8, 32], strides = [1, 1]} : vector<32x32xf32> to vector<8x32xf32>
    %119 = arith.truncf %117 : vector<8x8xf32> to vector<8x8xbf16>
    %120 = arith.truncf %118 : vector<8x32xf32> to vector<8x32xbf16>
    %cst_47 = arith.constant dense<0.000000e+00> : vector<8x32xf32>
    %121 = tpu.matmul %119, %120, %cst_47 {dimension_numbers = #tpu.dot_dimension_numbers<[1], [0], [0], [1], [0, 0, 1, 1], [], []>} : vector<8x8xbf16>, vector<8x32xbf16>, vector<8x32xf32> -> vector<8x32xf32>
    %122 = arith.addf %94, %121 : vector<8x32xf32>
    %123 = vector.extract_strided_slice %61 {offsets = [0, 16], sizes = [8, 8], strides = [1, 1]} : vector<8x32xf32> to vector<8x8xf32>
    %124 = vector.extract_strided_slice %62 {offsets = [0, 8], sizes = [24, 8], strides = [1, 1]} : vector<24x16xf32> to vector<24x8xf32>
    %125 = vector.extract_strided_slice %63 {offsets = [0, 8], sizes = [24, 8], strides = [1, 1]} : vector<24x16xf32> to vector<24x8xf32>
    %126 = arith.truncf %123 : vector<8x8xf32> to vector<8x8xbf16>
    %127 = arith.truncf %124 : vector<24x8xf32> to vector<24x8xbf16>
    %cst_48 = arith.constant dense<0.000000e+00> : vector<8x24xf32>
    %128 = tpu.matmul %126, %127, %cst_48 {dimension_numbers = #tpu.dot_dimension_numbers<[1], [1], [0], [0], [0, 0, 1, 0], [], []>} : vector<8x8xbf16>, vector<24x8xbf16>, vector<8x24xf32> -> vector<8x24xf32>
    %cst_49 = arith.constant 0.353553385 : f32
    %129 = vector.broadcast %cst_49 : f32 to vector<8x24xf32>
    %130 = arith.mulf %128, %129 : vector<8x24xf32>
    %131 = vector.broadcast %25 : vector<1x24xf32> to vector<8x24xf32>
    %132 = arith.addf %130, %131 : vector<8x24xf32>
    %cst_50 = arith.constant dense<0xFF800000> : vector<8xf32>
    %133 = vector.multi_reduction <maximumf>, %132, %cst_50 [1] : vector<8x24xf32> to vector<8xf32>
    %134 = vector.shape_cast %133 : vector<8xf32> to vector<8x1xf32>
    %135 = vector.broadcast %134 : vector<8x1xf32> to vector<8x24xf32>
    %136 = arith.subf %132, %135 : vector<8x24xf32>
    %137 = math.exp %136 : vector<8x24xf32>
    %cst_51 = arith.constant dense<0.000000e+00> : vector<8xf32>
    %138 = vector.multi_reduction <add>, %137, %cst_51 [1] : vector<8x24xf32> to vector<8xf32>
    %139 = vector.shape_cast %138 : vector<8xf32> to vector<8x1xf32>
    %140 = tpu.reciprocal %139 : vector<8x1xf32> -> vector<8x1xf32>
    %141 = vector.broadcast %140 : vector<8x1xf32> to vector<8x24xf32>
    %142 = arith.mulf %137, %141 : vector<8x24xf32>
    %143 = arith.truncf %142 : vector<8x24xf32> to vector<8x24xbf16>
    %144 = arith.truncf %125 : vector<24x8xf32> to vector<24x8xbf16>
    %cst_52 = arith.constant dense<0.000000e+00> : vector<8x8xf32>
    %145 = tpu.matmul %143, %144, %cst_52 {dimension_numbers = #tpu.dot_dimension_numbers<[1], [0], [0], [1], [0, 0, 1, 1], [], []>} : vector<8x24xbf16>, vector<24x8xbf16>, vector<8x8xf32> -> vector<8x8xf32>
    %146 = vector.extract_strided_slice %65 {offsets = [16, 0], sizes = [8, 32], strides = [1, 1]} : vector<32x32xf32> to vector<8x32xf32>
    %147 = arith.truncf %145 : vector<8x8xf32> to vector<8x8xbf16>
    %148 = arith.truncf %146 : vector<8x32xf32> to vector<8x32xbf16>
    %cst_53 = arith.constant dense<0.000000e+00> : vector<8x32xf32>
    %149 = tpu.matmul %147, %148, %cst_53 {dimension_numbers = #tpu.dot_dimension_numbers<[1], [0], [0], [1], [0, 0, 1, 1], [], []>} : vector<8x8xbf16>, vector<8x32xbf16>, vector<8x32xf32> -> vector<8x32xf32>
    %150 = arith.addf %122, %149 : vector<8x32xf32>
    %151 = vector.extract_strided_slice %61 {offsets = [0, 24], sizes = [8, 8], strides = [1, 1]} : vector<8x32xf32> to vector<8x8xf32>
    %152 = vector.extract_strided_slice %62 {offsets = [0, 8], sizes = [24, 8], strides = [1, 1]} : vector<24x16xf32> to vector<24x8xf32>
    %153 = vector.extract_strided_slice %63 {offsets = [0, 8], sizes = [24, 8], strides = [1, 1]} : vector<24x16xf32> to vector<24x8xf32>
    %154 = arith.truncf %151 : vector<8x8xf32> to vector<8x8xbf16>
    %155 = arith.truncf %152 : vector<24x8xf32> to vector<24x8xbf16>
    %cst_54 = arith.constant dense<0.000000e+00> : vector<8x24xf32>
    %156 = tpu.matmul %154, %155, %cst_54 {dimension_numbers = #tpu.dot_dimension_numbers<[1], [1], [0], [0], [0, 0, 1, 0], [], []>} : vector<8x8xbf16>, vector<24x8xbf16>, vector<8x24xf32> -> vector<8x24xf32>
    %cst_55 = arith.constant 0.353553385 : f32
    %157 = vector.broadcast %cst_55 : f32 to vector<8x24xf32>
    %158 = arith.mulf %156, %157 : vector<8x24xf32>
    %159 = vector.broadcast %25 : vector<1x24xf32> to vector<8x24xf32>
    %160 = arith.addf %158, %159 : vector<8x24xf32>
    %cst_56 = arith.constant dense<0xFF800000> : vector<8xf32>
    %161 = vector.multi_reduction <maximumf>, %160, %cst_56 [1] : vector<8x24xf32> to vector<8xf32>
    %162 = vector.shape_cast %161 : vector<8xf32> to vector<8x1xf32>
    %163 = vector.broadcast %162 : vector<8x1xf32> to vector<8x24xf32>
    %164 = arith.subf %160, %163 : vector<8x24xf32>
    %165 = math.exp %164 : vector<8x24xf32>
    %cst_57 = arith.constant dense<0.000000e+00> : vector<8xf32>
    %166 = vector.multi_reduction <add>, %165, %cst_57 [1] : vector<8x24xf32> to vector<8xf32>
    %167 = vector.shape_cast %166 : vector<8xf32> to vector<8x1xf32>
    %168 = tpu.reciprocal %167 : vector<8x1xf32> -> vector<8x1xf32>
    %169 = vector.broadcast %168 : vector<8x1xf32> to vector<8x24xf32>
    %170 = arith.mulf %165, %169 : vector<8x24xf32>
    %171 = arith.truncf %170 : vector<8x24xf32> to vector<8x24xbf16>
    %172 = arith.truncf %153 : vector<24x8xf32> to vector<24x8xbf16>
    %cst_58 = arith.constant dense<0.000000e+00> : vector<8x8xf32>
    %173 = tpu.matmul %171, %172, %cst_58 {dimension_numbers = #tpu.dot_dimension_numbers<[1], [0], [0], [1], [0, 0, 1, 1], [], []>} : vector<8x24xbf16>, vector<24x8xbf16>, vector<8x8xf32> -> vector<8x8xf32>
    %174 = vector.extract_strided_slice %65 {offsets = [24, 0], sizes = [8, 32], strides = [1, 1]} : vector<32x32xf32> to vector<8x32xf32>
    %175 = arith.truncf %173 : vector<8x8xf32> to vector<8x8xbf16>
    %176 = arith.truncf %174 : vector<8x32xf32> to vector<8x32xbf16>
    %cst_59 = arith.constant dense<0.000000e+00> : vector<8x32xf32>
    %177 = tpu.matmul %175, %176, %cst_59 {dimension_numbers = #tpu.dot_dimension_numbers<[1], [0], [0], [1], [0, 0, 1, 1], [], []>} : vector<8x8xbf16>, vector<8x32xbf16>, vector<8x32xf32> -> vector<8x32xf32>
    %178 = arith.addf %150, %177 : vector<8x32xf32>
    %179 = arith.addf %26, %178 : vector<8x32xf32>
    %c0_60 = arith.constant 0 : index
    %c0_61 = arith.constant 0 : index
    %c0_62 = arith.constant 0 : index
    %180 = vector.load %arg8[%c0_60, %c0_61, %c0_62] : memref<2x1x32xf32, #tpu.memory_space<vmem>>, vector<1x1x32xf32>
    %181 = vector.shape_cast %180 : vector<1x1x32xf32> to vector<1x32xf32>
    %182 = arith.mulf %179, %179 : vector<8x32xf32>
    %cst_63 = arith.constant dense<0.000000e+00> : vector<8xf32>
    %183 = vector.multi_reduction <add>, %182, %cst_63 [1] : vector<8x32xf32> to vector<8xf32>
    %184 = vector.shape_cast %183 : vector<8xf32> to vector<8x1xf32>
    %cst_64 = arith.constant 3.200000e+01 : f32
    %185 = vector.broadcast %cst_64 : f32 to vector<8x1xf32>
    %186 = arith.divf %184, %185 : vector<8x1xf32>
    %cst_65 = arith.constant 9.99999997E-7 : f32
    %187 = vector.broadcast %cst_65 : f32 to vector<8x1xf32>
    %188 = arith.addf %186, %187 : vector<8x1xf32>
    %189 = math.rsqrt %188 : vector<8x1xf32>
    %190 = vector.broadcast %189 : vector<8x1xf32> to vector<8x32xf32>
    %191 = arith.mulf %179, %190 : vector<8x32xf32>
    %192 = vector.broadcast %181 : vector<1x32xf32> to vector<8x32xf32>
    %193 = arith.mulf %191, %192 : vector<8x32xf32>
    %c0_66 = arith.constant 0 : index
    %c0_67 = arith.constant 0 : index
    %c0_68 = arith.constant 0 : index
    %194 = vector.load %arg11[%c0_66, %c0_67, %c0_68] : memref<2x32x256xf32, #tpu.memory_space<vmem>>, vector<1x32x256xf32>
    %195 = vector.shape_cast %194 : vector<1x32x256xf32> to vector<32x256xf32>
    %196 = arith.truncf %193 : vector<8x32xf32> to vector<8x32xbf16>
    %197 = arith.truncf %195 : vector<32x256xf32> to vector<32x256xbf16>
    %cst_69 = arith.constant dense<0.000000e+00> : vector<8x256xf32>
    %198 = tpu.matmul %196, %197, %cst_69 {dimension_numbers = #tpu.dot_dimension_numbers<[1], [0], [0], [1], [0, 0, 1, 1], [], []>} : vector<8x32xbf16>, vector<32x256xbf16>, vector<8x256xf32> -> vector<8x256xf32>
    %199 = vector.extract_strided_slice %198 {offsets = [0, 0], sizes = [8, 128], strides = [1, 1]} : vector<8x256xf32> to vector<8x128xf32>
    %200 = arith.negf %199 : vector<8x128xf32>
    %201 = math.exp %200 : vector<8x128xf32>
    %cst_70 = arith.constant 1.000000e+00 : f32
    %202 = vector.broadcast %cst_70 : f32 to vector<8x128xf32>
    %203 = arith.addf %202, %201 : vector<8x128xf32>
    %204 = arith.divf %202, %203 : vector<8x128xf32>
    %205 = arith.mulf %199, %204 : vector<8x128xf32>
    %206 = vector.extract_strided_slice %198 {offsets = [0, 128], sizes = [8, 128], strides = [1, 1]} : vector<8x256xf32> to vector<8x128xf32>
    %207 = arith.mulf %205, %206 : vector<8x128xf32>
    %c0_71 = arith.constant 0 : index
    %c0_72 = arith.constant 0 : index
    %c0_73 = arith.constant 0 : index
    %208 = vector.load %arg12[%c0_71, %c0_72, %c0_73] : memref<2x128x32xf32, #tpu.memory_space<vmem>>, vector<1x128x32xf32>
    %209 = vector.shape_cast %208 : vector<1x128x32xf32> to vector<128x32xf32>
    %210 = arith.truncf %207 : vector<8x128xf32> to vector<8x128xbf16>
    %211 = arith.truncf %209 : vector<128x32xf32> to vector<128x32xbf16>
    %cst_74 = arith.constant dense<0.000000e+00> : vector<8x32xf32>
    %212 = tpu.matmul %210, %211, %cst_74 {dimension_numbers = #tpu.dot_dimension_numbers<[1], [0], [0], [1], [0, 0, 1, 1], [], []>} : vector<8x128xbf16>, vector<128x32xbf16>, vector<8x32xf32> -> vector<8x32xf32>
    %213 = arith.addf %179, %212 : vector<8x32xf32>
    %c1 = arith.constant 1 : index
    %c0_75 = arith.constant 0 : index
    %c0_76 = arith.constant 0 : index
    %214 = vector.load %arg6[%c1, %c0_75, %c0_76] : memref<2x1x32xf32, #tpu.memory_space<vmem>>, vector<1x1x32xf32>
    %215 = vector.shape_cast %214 : vector<1x1x32xf32> to vector<1x32xf32>
    %216 = arith.mulf %213, %213 : vector<8x32xf32>
    %cst_77 = arith.constant dense<0.000000e+00> : vector<8xf32>
    %217 = vector.multi_reduction <add>, %216, %cst_77 [1] : vector<8x32xf32> to vector<8xf32>
    %218 = vector.shape_cast %217 : vector<8xf32> to vector<8x1xf32>
    %cst_78 = arith.constant 3.200000e+01 : f32
    %219 = vector.broadcast %cst_78 : f32 to vector<8x1xf32>
    %220 = arith.divf %218, %219 : vector<8x1xf32>
    %cst_79 = arith.constant 9.99999997E-7 : f32
    %221 = vector.broadcast %cst_79 : f32 to vector<8x1xf32>
    %222 = arith.addf %220, %221 : vector<8x1xf32>
    %223 = math.rsqrt %222 : vector<8x1xf32>
    %224 = vector.broadcast %223 : vector<8x1xf32> to vector<8x32xf32>
    %225 = arith.mulf %213, %224 : vector<8x32xf32>
    %226 = vector.broadcast %215 : vector<1x32xf32> to vector<8x32xf32>
    %227 = arith.mulf %225, %226 : vector<8x32xf32>
    %c1_80 = arith.constant 1 : index
    %c0_81 = arith.constant 0 : index
    %c0_82 = arith.constant 0 : index
    %228 = vector.load %arg7[%c1_80, %c0_81, %c0_82] : memref<2x1x32xf32, #tpu.memory_space<vmem>>, vector<1x1x32xf32>
    %229 = vector.shape_cast %228 : vector<1x1x32xf32> to vector<1x32xf32>
    %230 = arith.mulf %18, %18 : vector<16x32xf32>
    %cst_83 = arith.constant dense<0.000000e+00> : vector<16xf32>
    %231 = vector.multi_reduction <add>, %230, %cst_83 [1] : vector<16x32xf32> to vector<16xf32>
    %232 = vector.shape_cast %231 : vector<16xf32> to vector<16x1xf32>
    %cst_84 = arith.constant 3.200000e+01 : f32
    %233 = vector.broadcast %cst_84 : f32 to vector<16x1xf32>
    %234 = arith.divf %232, %233 : vector<16x1xf32>
    %cst_85 = arith.constant 9.99999997E-7 : f32
    %235 = vector.broadcast %cst_85 : f32 to vector<16x1xf32>
    %236 = arith.addf %234, %235 : vector<16x1xf32>
    %237 = math.rsqrt %236 : vector<16x1xf32>
    %238 = vector.broadcast %237 : vector<16x1xf32> to vector<16x32xf32>
    %239 = arith.mulf %18, %238 : vector<16x32xf32>
    %240 = vector.broadcast %229 : vector<1x32xf32> to vector<16x32xf32>
    %241 = arith.mulf %239, %240 : vector<16x32xf32>
    %242 = tpu.concatenate %241, %227 in 0 : vector<16x32xf32>, vector<8x32xf32> -> vector<24x32xf32>
    %c1_86 = arith.constant 1 : index
    %c0_87 = arith.constant 0 : index
    %c0_88 = arith.constant 0 : index
    %243 = vector.load %arg9[%c1_86, %c0_87, %c0_88] : memref<2x32x64xf32, #tpu.memory_space<vmem>>, vector<1x32x64xf32>
    %244 = vector.shape_cast %243 : vector<1x32x64xf32> to vector<32x64xf32>
    %245 = arith.truncf %242 : vector<24x32xf32> to vector<24x32xbf16>
    %246 = arith.truncf %244 : vector<32x64xf32> to vector<32x64xbf16>
    %cst_89 = arith.constant dense<0.000000e+00> : vector<24x64xf32>
    %247 = tpu.matmul %245, %246, %cst_89 {dimension_numbers = #tpu.dot_dimension_numbers<[1], [0], [0], [1], [0, 0, 1, 1], [], []>} : vector<24x32xbf16>, vector<32x64xbf16>, vector<24x64xf32> -> vector<24x64xf32>
    %248 = vector.extract_strided_slice %247 {offsets = [16, 0], sizes = [8, 32], strides = [1, 1]} : vector<24x64xf32> to vector<8x32xf32>
    %249 = vector.extract_strided_slice %247 {offsets = [0, 32], sizes = [24, 16], strides = [1, 1]} : vector<24x64xf32> to vector<24x16xf32>
    %250 = vector.extract_strided_slice %247 {offsets = [0, 48], sizes = [24, 16], strides = [1, 1]} : vector<24x64xf32> to vector<24x16xf32>
    %c1_90 = arith.constant 1 : index
    %c0_91 = arith.constant 0 : index
    %c0_92 = arith.constant 0 : index
    %251 = vector.load %arg10[%c1_90, %c0_91, %c0_92] : memref<2x32x32xf32, #tpu.memory_space<vmem>>, vector<1x32x32xf32>
    %252 = vector.shape_cast %251 : vector<1x32x32xf32> to vector<32x32xf32>
    %cst_93 = arith.constant 0.000000e+00 : f32
    %253 = vector.broadcast %cst_93 : f32 to vector<8x32xf32>
    %254 = vector.extract_strided_slice %248 {offsets = [0, 0], sizes = [8, 8], strides = [1, 1]} : vector<8x32xf32> to vector<8x8xf32>
    %255 = vector.extract_strided_slice %249 {offsets = [0, 0], sizes = [24, 8], strides = [1, 1]} : vector<24x16xf32> to vector<24x8xf32>
    %256 = vector.extract_strided_slice %250 {offsets = [0, 0], sizes = [24, 8], strides = [1, 1]} : vector<24x16xf32> to vector<24x8xf32>
    %257 = arith.truncf %254 : vector<8x8xf32> to vector<8x8xbf16>
    %258 = arith.truncf %255 : vector<24x8xf32> to vector<24x8xbf16>
    %cst_94 = arith.constant dense<0.000000e+00> : vector<8x24xf32>
    %259 = tpu.matmul %257, %258, %cst_94 {dimension_numbers = #tpu.dot_dimension_numbers<[1], [1], [0], [0], [0, 0, 1, 0], [], []>} : vector<8x8xbf16>, vector<24x8xbf16>, vector<8x24xf32> -> vector<8x24xf32>
    %cst_95 = arith.constant 0.353553385 : f32
    %260 = vector.broadcast %cst_95 : f32 to vector<8x24xf32>
    %261 = arith.mulf %259, %260 : vector<8x24xf32>
    %262 = vector.broadcast %25 : vector<1x24xf32> to vector<8x24xf32>
    %263 = arith.addf %261, %262 : vector<8x24xf32>
    %cst_96 = arith.constant dense<0xFF800000> : vector<8xf32>
    %264 = vector.multi_reduction <maximumf>, %263, %cst_96 [1] : vector<8x24xf32> to vector<8xf32>
    %265 = vector.shape_cast %264 : vector<8xf32> to vector<8x1xf32>
    %266 = vector.broadcast %265 : vector<8x1xf32> to vector<8x24xf32>
    %267 = arith.subf %263, %266 : vector<8x24xf32>
    %268 = math.exp %267 : vector<8x24xf32>
    %cst_97 = arith.constant dense<0.000000e+00> : vector<8xf32>
    %269 = vector.multi_reduction <add>, %268, %cst_97 [1] : vector<8x24xf32> to vector<8xf32>
    %270 = vector.shape_cast %269 : vector<8xf32> to vector<8x1xf32>
    %271 = tpu.reciprocal %270 : vector<8x1xf32> -> vector<8x1xf32>
    %272 = vector.broadcast %271 : vector<8x1xf32> to vector<8x24xf32>
    %273 = arith.mulf %268, %272 : vector<8x24xf32>
    %274 = arith.truncf %273 : vector<8x24xf32> to vector<8x24xbf16>
    %275 = arith.truncf %256 : vector<24x8xf32> to vector<24x8xbf16>
    %cst_98 = arith.constant dense<0.000000e+00> : vector<8x8xf32>
    %276 = tpu.matmul %274, %275, %cst_98 {dimension_numbers = #tpu.dot_dimension_numbers<[1], [0], [0], [1], [0, 0, 1, 1], [], []>} : vector<8x24xbf16>, vector<24x8xbf16>, vector<8x8xf32> -> vector<8x8xf32>
    %277 = vector.extract_strided_slice %252 {offsets = [0, 0], sizes = [8, 32], strides = [1, 1]} : vector<32x32xf32> to vector<8x32xf32>
    %278 = arith.truncf %276 : vector<8x8xf32> to vector<8x8xbf16>
    %279 = arith.truncf %277 : vector<8x32xf32> to vector<8x32xbf16>
    %cst_99 = arith.constant dense<0.000000e+00> : vector<8x32xf32>
    %280 = tpu.matmul %278, %279, %cst_99 {dimension_numbers = #tpu.dot_dimension_numbers<[1], [0], [0], [1], [0, 0, 1, 1], [], []>} : vector<8x8xbf16>, vector<8x32xbf16>, vector<8x32xf32> -> vector<8x32xf32>
    %281 = arith.addf %253, %280 : vector<8x32xf32>
    %282 = vector.extract_strided_slice %248 {offsets = [0, 8], sizes = [8, 8], strides = [1, 1]} : vector<8x32xf32> to vector<8x8xf32>
    %283 = vector.extract_strided_slice %249 {offsets = [0, 0], sizes = [24, 8], strides = [1, 1]} : vector<24x16xf32> to vector<24x8xf32>
    %284 = vector.extract_strided_slice %250 {offsets = [0, 0], sizes = [24, 8], strides = [1, 1]} : vector<24x16xf32> to vector<24x8xf32>
    %285 = arith.truncf %282 : vector<8x8xf32> to vector<8x8xbf16>
    %286 = arith.truncf %283 : vector<24x8xf32> to vector<24x8xbf16>
    %cst_100 = arith.constant dense<0.000000e+00> : vector<8x24xf32>
    %287 = tpu.matmul %285, %286, %cst_100 {dimension_numbers = #tpu.dot_dimension_numbers<[1], [1], [0], [0], [0, 0, 1, 0], [], []>} : vector<8x8xbf16>, vector<24x8xbf16>, vector<8x24xf32> -> vector<8x24xf32>
    %cst_101 = arith.constant 0.353553385 : f32
    %288 = vector.broadcast %cst_101 : f32 to vector<8x24xf32>
    %289 = arith.mulf %287, %288 : vector<8x24xf32>
    %290 = vector.broadcast %25 : vector<1x24xf32> to vector<8x24xf32>
    %291 = arith.addf %289, %290 : vector<8x24xf32>
    %cst_102 = arith.constant dense<0xFF800000> : vector<8xf32>
    %292 = vector.multi_reduction <maximumf>, %291, %cst_102 [1] : vector<8x24xf32> to vector<8xf32>
    %293 = vector.shape_cast %292 : vector<8xf32> to vector<8x1xf32>
    %294 = vector.broadcast %293 : vector<8x1xf32> to vector<8x24xf32>
    %295 = arith.subf %291, %294 : vector<8x24xf32>
    %296 = math.exp %295 : vector<8x24xf32>
    %cst_103 = arith.constant dense<0.000000e+00> : vector<8xf32>
    %297 = vector.multi_reduction <add>, %296, %cst_103 [1] : vector<8x24xf32> to vector<8xf32>
    %298 = vector.shape_cast %297 : vector<8xf32> to vector<8x1xf32>
    %299 = tpu.reciprocal %298 : vector<8x1xf32> -> vector<8x1xf32>
    %300 = vector.broadcast %299 : vector<8x1xf32> to vector<8x24xf32>
    %301 = arith.mulf %296, %300 : vector<8x24xf32>
    %302 = arith.truncf %301 : vector<8x24xf32> to vector<8x24xbf16>
    %303 = arith.truncf %284 : vector<24x8xf32> to vector<24x8xbf16>
    %cst_104 = arith.constant dense<0.000000e+00> : vector<8x8xf32>
    %304 = tpu.matmul %302, %303, %cst_104 {dimension_numbers = #tpu.dot_dimension_numbers<[1], [0], [0], [1], [0, 0, 1, 1], [], []>} : vector<8x24xbf16>, vector<24x8xbf16>, vector<8x8xf32> -> vector<8x8xf32>
    %305 = vector.extract_strided_slice %252 {offsets = [8, 0], sizes = [8, 32], strides = [1, 1]} : vector<32x32xf32> to vector<8x32xf32>
    %306 = arith.truncf %304 : vector<8x8xf32> to vector<8x8xbf16>
    %307 = arith.truncf %305 : vector<8x32xf32> to vector<8x32xbf16>
    %cst_105 = arith.constant dense<0.000000e+00> : vector<8x32xf32>
    %308 = tpu.matmul %306, %307, %cst_105 {dimension_numbers = #tpu.dot_dimension_numbers<[1], [0], [0], [1], [0, 0, 1, 1], [], []>} : vector<8x8xbf16>, vector<8x32xbf16>, vector<8x32xf32> -> vector<8x32xf32>
    %309 = arith.addf %281, %308 : vector<8x32xf32>
    %310 = vector.extract_strided_slice %248 {offsets = [0, 16], sizes = [8, 8], strides = [1, 1]} : vector<8x32xf32> to vector<8x8xf32>
    %311 = vector.extract_strided_slice %249 {offsets = [0, 8], sizes = [24, 8], strides = [1, 1]} : vector<24x16xf32> to vector<24x8xf32>
    %312 = vector.extract_strided_slice %250 {offsets = [0, 8], sizes = [24, 8], strides = [1, 1]} : vector<24x16xf32> to vector<24x8xf32>
    %313 = arith.truncf %310 : vector<8x8xf32> to vector<8x8xbf16>
    %314 = arith.truncf %311 : vector<24x8xf32> to vector<24x8xbf16>
    %cst_106 = arith.constant dense<0.000000e+00> : vector<8x24xf32>
    %315 = tpu.matmul %313, %314, %cst_106 {dimension_numbers = #tpu.dot_dimension_numbers<[1], [1], [0], [0], [0, 0, 1, 0], [], []>} : vector<8x8xbf16>, vector<24x8xbf16>, vector<8x24xf32> -> vector<8x24xf32>
    %cst_107 = arith.constant 0.353553385 : f32
    %316 = vector.broadcast %cst_107 : f32 to vector<8x24xf32>
    %317 = arith.mulf %315, %316 : vector<8x24xf32>
    %318 = vector.broadcast %25 : vector<1x24xf32> to vector<8x24xf32>
    %319 = arith.addf %317, %318 : vector<8x24xf32>
    %cst_108 = arith.constant dense<0xFF800000> : vector<8xf32>
    %320 = vector.multi_reduction <maximumf>, %319, %cst_108 [1] : vector<8x24xf32> to vector<8xf32>
    %321 = vector.shape_cast %320 : vector<8xf32> to vector<8x1xf32>
    %322 = vector.broadcast %321 : vector<8x1xf32> to vector<8x24xf32>
    %323 = arith.subf %319, %322 : vector<8x24xf32>
    %324 = math.exp %323 : vector<8x24xf32>
    %cst_109 = arith.constant dense<0.000000e+00> : vector<8xf32>
    %325 = vector.multi_reduction <add>, %324, %cst_109 [1] : vector<8x24xf32> to vector<8xf32>
    %326 = vector.shape_cast %325 : vector<8xf32> to vector<8x1xf32>
    %327 = tpu.reciprocal %326 : vector<8x1xf32> -> vector<8x1xf32>
    %328 = vector.broadcast %327 : vector<8x1xf32> to vector<8x24xf32>
    %329 = arith.mulf %324, %328 : vector<8x24xf32>
    %330 = arith.truncf %329 : vector<8x24xf32> to vector<8x24xbf16>
    %331 = arith.truncf %312 : vector<24x8xf32> to vector<24x8xbf16>
    %cst_110 = arith.constant dense<0.000000e+00> : vector<8x8xf32>
    %332 = tpu.matmul %330, %331, %cst_110 {dimension_numbers = #tpu.dot_dimension_numbers<[1], [0], [0], [1], [0, 0, 1, 1], [], []>} : vector<8x24xbf16>, vector<24x8xbf16>, vector<8x8xf32> -> vector<8x8xf32>
    %333 = vector.extract_strided_slice %252 {offsets = [16, 0], sizes = [8, 32], strides = [1, 1]} : vector<32x32xf32> to vector<8x32xf32>
    %334 = arith.truncf %332 : vector<8x8xf32> to vector<8x8xbf16>
    %335 = arith.truncf %333 : vector<8x32xf32> to vector<8x32xbf16>
    %cst_111 = arith.constant dense<0.000000e+00> : vector<8x32xf32>
    %336 = tpu.matmul %334, %335, %cst_111 {dimension_numbers = #tpu.dot_dimension_numbers<[1], [0], [0], [1], [0, 0, 1, 1], [], []>} : vector<8x8xbf16>, vector<8x32xbf16>, vector<8x32xf32> -> vector<8x32xf32>
    %337 = arith.addf %309, %336 : vector<8x32xf32>
    %338 = vector.extract_strided_slice %248 {offsets = [0, 24], sizes = [8, 8], strides = [1, 1]} : vector<8x32xf32> to vector<8x8xf32>
    %339 = vector.extract_strided_slice %249 {offsets = [0, 8], sizes = [24, 8], strides = [1, 1]} : vector<24x16xf32> to vector<24x8xf32>
    %340 = vector.extract_strided_slice %250 {offsets = [0, 8], sizes = [24, 8], strides = [1, 1]} : vector<24x16xf32> to vector<24x8xf32>
    %341 = arith.truncf %338 : vector<8x8xf32> to vector<8x8xbf16>
    %342 = arith.truncf %339 : vector<24x8xf32> to vector<24x8xbf16>
    %cst_112 = arith.constant dense<0.000000e+00> : vector<8x24xf32>
    %343 = tpu.matmul %341, %342, %cst_112 {dimension_numbers = #tpu.dot_dimension_numbers<[1], [1], [0], [0], [0, 0, 1, 0], [], []>} : vector<8x8xbf16>, vector<24x8xbf16>, vector<8x24xf32> -> vector<8x24xf32>
    %cst_113 = arith.constant 0.353553385 : f32
    %344 = vector.broadcast %cst_113 : f32 to vector<8x24xf32>
    %345 = arith.mulf %343, %344 : vector<8x24xf32>
    %346 = vector.broadcast %25 : vector<1x24xf32> to vector<8x24xf32>
    %347 = arith.addf %345, %346 : vector<8x24xf32>
    %cst_114 = arith.constant dense<0xFF800000> : vector<8xf32>
    %348 = vector.multi_reduction <maximumf>, %347, %cst_114 [1] : vector<8x24xf32> to vector<8xf32>
    %349 = vector.shape_cast %348 : vector<8xf32> to vector<8x1xf32>
    %350 = vector.broadcast %349 : vector<8x1xf32> to vector<8x24xf32>
    %351 = arith.subf %347, %350 : vector<8x24xf32>
    %352 = math.exp %351 : vector<8x24xf32>
    %cst_115 = arith.constant dense<0.000000e+00> : vector<8xf32>
    %353 = vector.multi_reduction <add>, %352, %cst_115 [1] : vector<8x24xf32> to vector<8xf32>
    %354 = vector.shape_cast %353 : vector<8xf32> to vector<8x1xf32>
    %355 = tpu.reciprocal %354 : vector<8x1xf32> -> vector<8x1xf32>
    %356 = vector.broadcast %355 : vector<8x1xf32> to vector<8x24xf32>
    %357 = arith.mulf %352, %356 : vector<8x24xf32>
    %358 = arith.truncf %357 : vector<8x24xf32> to vector<8x24xbf16>
    %359 = arith.truncf %340 : vector<24x8xf32> to vector<24x8xbf16>
    %cst_116 = arith.constant dense<0.000000e+00> : vector<8x8xf32>
    %360 = tpu.matmul %358, %359, %cst_116 {dimension_numbers = #tpu.dot_dimension_numbers<[1], [0], [0], [1], [0, 0, 1, 1], [], []>} : vector<8x24xbf16>, vector<24x8xbf16>, vector<8x8xf32> -> vector<8x8xf32>
    %361 = vector.extract_strided_slice %252 {offsets = [24, 0], sizes = [8, 32], strides = [1, 1]} : vector<32x32xf32> to vector<8x32xf32>
    %362 = arith.truncf %360 : vector<8x8xf32> to vector<8x8xbf16>
    %363 = arith.truncf %361 : vector<8x32xf32> to vector<8x32xbf16>
    %cst_117 = arith.constant dense<0.000000e+00> : vector<8x32xf32>
    %364 = tpu.matmul %362, %363, %cst_117 {dimension_numbers = #tpu.dot_dimension_numbers<[1], [0], [0], [1], [0, 0, 1, 1], [], []>} : vector<8x8xbf16>, vector<8x32xbf16>, vector<8x32xf32> -> vector<8x32xf32>
    %365 = arith.addf %337, %364 : vector<8x32xf32>
    %366 = arith.addf %213, %365 : vector<8x32xf32>
    %c1_118 = arith.constant 1 : index
    %c0_119 = arith.constant 0 : index
    %c0_120 = arith.constant 0 : index
    %367 = vector.load %arg8[%c1_118, %c0_119, %c0_120] : memref<2x1x32xf32, #tpu.memory_space<vmem>>, vector<1x1x32xf32>
    %368 = vector.shape_cast %367 : vector<1x1x32xf32> to vector<1x32xf32>
    %369 = arith.mulf %366, %366 : vector<8x32xf32>
    %cst_121 = arith.constant dense<0.000000e+00> : vector<8xf32>
    %370 = vector.multi_reduction <add>, %369, %cst_121 [1] : vector<8x32xf32> to vector<8xf32>
    %371 = vector.shape_cast %370 : vector<8xf32> to vector<8x1xf32>
    %cst_122 = arith.constant 3.200000e+01 : f32
    %372 = vector.broadcast %cst_122 : f32 to vector<8x1xf32>
    %373 = arith.divf %371, %372 : vector<8x1xf32>
    %cst_123 = arith.constant 9.99999997E-7 : f32
    %374 = vector.broadcast %cst_123 : f32 to vector<8x1xf32>
    %375 = arith.addf %373, %374 : vector<8x1xf32>
    %376 = math.rsqrt %375 : vector<8x1xf32>
    %377 = vector.broadcast %376 : vector<8x1xf32> to vector<8x32xf32>
    %378 = arith.mulf %366, %377 : vector<8x32xf32>
    %379 = vector.broadcast %368 : vector<1x32xf32> to vector<8x32xf32>
    %380 = arith.mulf %378, %379 : vector<8x32xf32>
    %c1_124 = arith.constant 1 : index
    %c0_125 = arith.constant 0 : index
    %c0_126 = arith.constant 0 : index
    %381 = vector.load %arg11[%c1_124, %c0_125, %c0_126] : memref<2x32x256xf32, #tpu.memory_space<vmem>>, vector<1x32x256xf32>
    %382 = vector.shape_cast %381 : vector<1x32x256xf32> to vector<32x256xf32>
    %383 = arith.truncf %380 : vector<8x32xf32> to vector<8x32xbf16>
    %384 = arith.truncf %382 : vector<32x256xf32> to vector<32x256xbf16>
    %cst_127 = arith.constant dense<0.000000e+00> : vector<8x256xf32>
    %385 = tpu.matmul %383, %384, %cst_127 {dimension_numbers = #tpu.dot_dimension_numbers<[1], [0], [0], [1], [0, 0, 1, 1], [], []>} : vector<8x32xbf16>, vector<32x256xbf16>, vector<8x256xf32> -> vector<8x256xf32>
    %386 = vector.extract_strided_slice %385 {offsets = [0, 0], sizes = [8, 128], strides = [1, 1]} : vector<8x256xf32> to vector<8x128xf32>
    %387 = arith.negf %386 : vector<8x128xf32>
    %388 = math.exp %387 : vector<8x128xf32>
    %cst_128 = arith.constant 1.000000e+00 : f32
    %389 = vector.broadcast %cst_128 : f32 to vector<8x128xf32>
    %390 = arith.addf %389, %388 : vector<8x128xf32>
    %391 = arith.divf %389, %390 : vector<8x128xf32>
    %392 = arith.mulf %386, %391 : vector<8x128xf32>
    %393 = vector.extract_strided_slice %385 {offsets = [0, 128], sizes = [8, 128], strides = [1, 1]} : vector<8x256xf32> to vector<8x128xf32>
    %394 = arith.mulf %392, %393 : vector<8x128xf32>
    %c1_129 = arith.constant 1 : index
    %c0_130 = arith.constant 0 : index
    %c0_131 = arith.constant 0 : index
    %395 = vector.load %arg12[%c1_129, %c0_130, %c0_131] : memref<2x128x32xf32, #tpu.memory_space<vmem>>, vector<1x128x32xf32>
    %396 = vector.shape_cast %395 : vector<1x128x32xf32> to vector<128x32xf32>
    %397 = arith.truncf %394 : vector<8x128xf32> to vector<8x128xbf16>
    %398 = arith.truncf %396 : vector<128x32xf32> to vector<128x32xbf16>
    %cst_132 = arith.constant dense<0.000000e+00> : vector<8x32xf32>
    %399 = tpu.matmul %397, %398, %cst_132 {dimension_numbers = #tpu.dot_dimension_numbers<[1], [0], [0], [1], [0, 0, 1, 1], [], []>} : vector<8x128xbf16>, vector<128x32xbf16>, vector<8x32xf32> -> vector<8x32xf32>
    %400 = arith.addf %366, %399 : vector<8x32xf32>
    %c0_133 = arith.constant 0 : index
    %c0_134 = arith.constant 0 : index
    %401 = vector.load %arg13[%c0_133, %c0_134] : memref<1x32xf32, #tpu.memory_space<vmem>>, vector<1x32xf32>
    %402 = arith.mulf %400, %400 : vector<8x32xf32>
    %cst_135 = arith.constant dense<0.000000e+00> : vector<8xf32>
    %403 = vector.multi_reduction <add>, %402, %cst_135 [1] : vector<8x32xf32> to vector<8xf32>
    %404 = vector.shape_cast %403 : vector<8xf32> to vector<8x1xf32>
    %cst_136 = arith.constant 3.200000e+01 : f32
    %405 = vector.broadcast %cst_136 : f32 to vector<8x1xf32>
    %406 = arith.divf %404, %405 : vector<8x1xf32>
    %cst_137 = arith.constant 9.99999997E-7 : f32
    %407 = vector.broadcast %cst_137 : f32 to vector<8x1xf32>
    %408 = arith.addf %406, %407 : vector<8x1xf32>
    %409 = math.rsqrt %408 : vector<8x1xf32>
    %410 = vector.broadcast %409 : vector<8x1xf32> to vector<8x32xf32>
    %411 = arith.mulf %400, %410 : vector<8x32xf32>
    %412 = vector.broadcast %401 : vector<1x32xf32> to vector<8x32xf32>
    %413 = arith.mulf %411, %412 : vector<8x32xf32>
    %c0_138 = arith.constant 0 : index
    %c0_139 = arith.constant 0 : index
    %c0_140 = arith.constant 0 : index
    %414 = vector.load %arg14[%c0_138, %c0_139, %c0_140] : memref<1x8x32xf32, #tpu.memory_space<vmem>>, vector<1x8x32xf32>
    %415 = vector.shape_cast %414 : vector<1x8x32xf32> to vector<8x32xf32>
    %416 = vector.shape_cast %413 : vector<8x32xf32> to vector<1x8x32xf32>
    tpu.vector_store %arg14[%c0_138, %c0_139, %c0_140], %416 {strides = array<i32>} : memref<1x8x32xf32, #tpu.memory_space<vmem>>, vector<1x8x32xf32>,
    return
  }
  func.func @transform_0(%arg0: i32) -> (i32, i32, i32) {
    %c0_i32 = arith.constant 0 : i32
    %c0_i32_0 = arith.constant 0 : i32
    %c0_i32_1 = arith.constant 0 : i32
    return %arg0, %c0_i32, %c0_i32_0 : i32, i32, i32
  }
  func.func @transform_1(%arg0: i32) -> (i32, i32, i32) {
    %c0_i32 = arith.constant 0 : i32
    %c0_i32_0 = arith.constant 0 : i32
    %c0_i32_1 = arith.constant 0 : i32
    return %arg0, %c0_i32, %c0_i32_0 : i32, i32, i32
  }
  func.func @transform_2(%arg0: i32) -> (i32, i32) {
    %c0_i32 = arith.constant 0 : i32
    %c0_i32_0 = arith.constant 0 : i32
    %c0_i32_1 = arith.constant 0 : i32
    return %c0_i32, %c0_i32_0 : i32, i32
  }
  func.func @transform_3(%arg0: i32) -> (i32, i32) {
    %c0_i32 = arith.constant 0 : i32
    %c0_i32_0 = arith.constant 0 : i32
    %c0_i32_1 = arith.constant 0 : i32
    return %c0_i32, %c0_i32_0 : i32, i32
  }
  func.func @transform_4(%arg0: i32) -> (i32, i32) {
    %c0_i32 = arith.constant 0 : i32
    %c0_i32_0 = arith.constant 0 : i32
    %c0_i32_1 = arith.constant 0 : i32
    return %c0_i32, %c0_i32_0 : i32, i32
  }
  func.func @transform_5(%arg0: i32) -> (i32, i32, i32) {
    %c0_i32 = arith.constant 0 : i32
    %c0_i32_0 = arith.constant 0 : i32
    %c0_i32_1 = arith.constant 0 : i32
    %c0_i32_2 = arith.constant 0 : i32
    return %c0_i32, %c0_i32_0, %c0_i32_1 : i32, i32, i32
  }
  func.func @transform_6(%arg0: i32) -> (i32, i32, i32) {
    %c0_i32 = arith.constant 0 : i32
    %c0_i32_0 = arith.constant 0 : i32
    %c0_i32_1 = arith.constant 0 : i32
    %c0_i32_2 = arith.constant 0 : i32
    return %c0_i32, %c0_i32_0, %c0_i32_1 : i32, i32, i32
  }
  func.func @transform_7(%arg0: i32) -> (i32, i32, i32) {
    %c0_i32 = arith.constant 0 : i32
    %c0_i32_0 = arith.constant 0 : i32
    %c0_i32_1 = arith.constant 0 : i32
    %c0_i32_2 = arith.constant 0 : i32
    return %c0_i32, %c0_i32_0, %c0_i32_1 : i32, i32, i32
  }
  func.func @transform_8(%arg0: i32) -> (i32, i32, i32) {
    %c0_i32 = arith.constant 0 : i32
    %c0_i32_0 = arith.constant 0 : i32
    %c0_i32_1 = arith.constant 0 : i32
    %c0_i32_2 = arith.constant 0 : i32
    return %c0_i32, %c0_i32_0, %c0_i32_1 : i32, i32, i32
  }
  func.func @transform_9(%arg0: i32) -> (i32, i32, i32) {
    %c0_i32 = arith.constant 0 : i32
    %c0_i32_0 = arith.constant 0 : i32
    %c0_i32_1 = arith.constant 0 : i32
    %c0_i32_2 = arith.constant 0 : i32
    return %c0_i32, %c0_i32_0, %c0_i32_1 : i32, i32, i32
  }
  func.func @transform_10(%arg0: i32) -> (i32, i32, i32) {
    %c0_i32 = arith.constant 0 : i32
    %c0_i32_0 = arith.constant 0 : i32
    %c0_i32_1 = arith.constant 0 : i32
    %c0_i32_2 = arith.constant 0 : i32
    return %c0_i32, %c0_i32_0, %c0_i32_1 : i32, i32, i32
  }
  func.func @transform_11(%arg0: i32) -> (i32, i32, i32) {
    %c0_i32 = arith.constant 0 : i32
    %c0_i32_0 = arith.constant 0 : i32
    %c0_i32_1 = arith.constant 0 : i32
    %c0_i32_2 = arith.constant 0 : i32
    return %c0_i32, %c0_i32_0, %c0_i32_1 : i32, i32, i32
  }
  func.func @transform_12(%arg0: i32) -> (i32, i32) {
    %c0_i32 = arith.constant 0 : i32
    %c0_i32_0 = arith.constant 0 : i32
    %c0_i32_1 = arith.constant 0 : i32
    return %c0_i32, %c0_i32_0 : i32, i32
  }
  func.func @transform_13(%arg0: i32) -> (i32, i32, i32) {
    %c0_i32 = arith.constant 0 : i32
    %c0_i32_0 = arith.constant 0 : i32
    %c0_i32_1 = arith.constant 0 : i32
    return %arg0, %c0_i32, %c0_i32_0 : i32, i32, i32
  }
}

</mosaic_0001>

<bundles_post_ra>
// kernel: _connector_and_merge.1
= control target key start
LH: loop header
LB: loop body
LE: loop exit
PB: predicated region body
PF: predicated region fallthrough
CT: control target
= control target key end

     0   :  { %s3082_s25 = smov 0   ;;  %s3663_s0 = inlined_call_operand.vmem [shape: f32[2,16,48], index: 0, kind: input, shape index: {}]   ;;  %s3664_s1 = inlined_call_operand.vmem [shape: f32[2,1,24], index: 1, kind: input, shape index: {}]   ;;  %s3665_s2 = inlined_call_operand.vmem [shape: f32[48,128], index: 2, kind: input, shape index: {}]   ;;  %s3666_s3 = inlined_call_operand.vmem [shape: f32[64,32], index: 3, kind: input, shape index: {}]   ;;  %s3667_s4 = inlined_call_operand.vmem [shape: f32[8,32], index: 4, kind: input, shape index: {}]   ;;  %s3668_s5 = inlined_call_operand.vmem [shape: f32[2,1,32], index: 5, kind: input, shape index: {}]   ;;  %s3669_s6 = inlined_call_operand.vmem [shape: f32[2,1,32], index: 6, kind: input, shape index: {}]   ;;  %s3670_s7 = inlined_call_operand.vmem [shape: f32[2,1,32], index: 7, kind: input, shape index: {}]   ;;  %s3671_s8 = inlined_call_operand.vmem [shape: f32[2,32,64], index: 8, kind: input, shape index: {}]   ;;  %s3672_s9 = inlined_call_operand.vmem [shape: f32[2,32,32], index: 9, kind: input, shape index: {}]   ;;  %s3673_s10 = inlined_call_operand.vmem [shape: f32[2,32,256], index: 10, kind: input, shape index: {}]   ;;  %s3674_s11 = inlined_call_operand.vmem [shape: f32[2,128,32], index: 11, kind: input, shape index: {}]   ;;  %s3675_s12 = inlined_call_operand.vmem [shape: f32[1,32], index: 12, kind: input, shape index: {}]   ;;  %s3676_s13 = inlined_call_operand.vmem [shape: f32[2,8,32], index: 13, kind: output, shape index: {}]  }
   0x1 LB: > { %s2468_s26 = sadd.s32 4294967295, %s2998_s25   ;;  %p2472_p0 = scmp.ge.s32.totalorder %s2998_s25, 1  ;;  %s2998_s25 = sphi %s3082_s25, %s23_s25  }
   0x2   : > { %p395_p1 = scmp.lt.s32.totalorder %s2998_s25, 3 }
   0x4   : > { %p396_p2 = pnand %p2472_p0, %p395_p1 }
   0x5   : > { %v456_v0 = vld [vmem:[%s3665_s2] sm:$0xff] (!%p396_p2)  ;;  %v457_v1 = vld [vmem:[%s3665_s2 + $0x8] sm:$0xff] (!%p396_p2)  ;;  %v458_v2 = vld [vmem:[%s3665_s2 + $0x10] sm:$0xff] (!%p396_p2)  ;;  %p441_p3 = scmp.lt.s32.totalorder (!%p396_p2), %s2468_s26, 1  ;;  %v3000_v3 = vmov (!%p396_p2), 0.0   ;;  %vm3001_vm0 = vmmov (!%p396_p2), 0  }
   0x6   : > { %399 = sbr.rel (%p396_p2) target bundleno = 7460 (0x1d24), region = 72  ;;  %2656 = vmatprep.subr.bf16.mxu1 (!%p396_p2), %v3000_v3  ;;  %v463_v4 = vpack.c.bf16 (!%p396_p2), %v457_v1, %v456_v0  ;;  %v459_v5 = vld [vmem:[%s3665_s2 + $0x18] sm:$0xff] (!%p396_p2)  ;;  %2662 = vmatprep.mubr.msk.bf16.mxu1 (!%p396_p2), %vm3001_vm0, %v3000_v3  ;;  %v460_v7 = vld [vmem:[%s3665_s2 + $0x20] sm:$0xff] (!%p396_p2)  ;;  %v461_v8 = vld [vmem:[%s3665_s2 + $0x28] sm:$0xff] (!%p396_p2)  ;;  %vm466_vm1 = vcmask (!%p396_p2), 392192   ;;  %s3002_s29 = smov (!%p396_p2), 64  }
   0x7   : > { %v464_v6 = vpack.c.bf16 (!%p396_p2), %v459_v5, %v458_v2  ;;  %v465_v9 = vpack.c.bf16 (!%p396_p2), %v461_v8, %v460_v7  ;;  %v535_v13 = vld [vmem:[%s3666_s3] sm:$0xff] (!%p396_p2)  ;;  %v536_v14 = vld [vmem:[%s3666_s3 + $0x8] sm:$0xff] (!%p396_p2)  ;;  %v537_v15 = vld [vmem:[%s3666_s3 + $0x10] sm:$0xff] (!%p396_p2)  ;;  %vm548_vm2 = vcmask (!%p396_p2), 523264   ;;  %vm599_vm3 = vcmask (!%p396_p2), 261120   ;;  %s3003_s14 = smov (!%p396_p2), 80  }
   0x8   : > { %2657 = vmatpush3.bf16.msra.mxu1 (!%p396_p2), %v463_v4  ;;  %v544_v16 = vpack.c.bf16 (!%p396_p2), %v536_v14, %v535_v13  ;;  %v538_v17 = vld [vmem:[%s3666_s3 + $0x18] sm:$0xff] (!%p396_p2)  ;;  %v539_v19 = vld [vmem:[%s3666_s3 + $0x20] sm:$0xff] (!%p396_p2)  ;;  %v540_v20 = vld [vmem:[%s3666_s3 + $0x28] sm:$0xff] (!%p396_p2)  ;;  %s3004_s15 = smov (!%p396_p2), 96   ;;  %vm714_vm4 = vcmask (!%p396_p2), 64512   ;;  %vm772_vm6 = vcmask (!%p396_p2), 195584  }
   0x9   : > { %2658 = vmatprep.subr.bf16.mxu1 (!%p396_p2), %v3000_v3  ;;  %v545_v18 = vpack.c.bf16 (!%p396_p2), %v538_v17, %v537_v15  ;;  %v546_v21 = vpack.c.bf16 (!%p396_p2), %v540_v20, %v539_v19  ;;  %v541_v22 = vld [vmem:[%s3666_s3 + $0x30] sm:$0xff] (!%p396_p2)  ;;  %v542_v23 = vld [vmem:[%s3666_s3 + $0x38] sm:$0xff] (!%p396_p2)  ;;  %v3155_v44 = vld [vmem:[%s3667_s4] sm:$0xff] (!%p396_p2)  ;;  %s3006_s19 = smov (!%p396_p2), 120   ;;  %vm793_vm7 = vcmask (!%p396_p2), 1043456   ;;  %s3679_s23 = smov (!%p396_p2), 112  }
   0xa   : > { %v547_v24 = vpack.c.bf16 (!%p396_p2), %v542_v23, %v541_v22  ;;  %v598_v45 = vmul.f32 (!%p396_p2), %v3155_v44, %v3155_v44  ;;  %v640_v55 = vld [vmem:[%s3671_s8] sm:$0xff] (!%p396_p2)  ;;  %v641_v56 = vld [vmem:[%s3671_s8 + $0x8] sm:$0xff] (!%p396_p2)  ;;  %v642_v57 = vld [vmem:[%s3671_s8 + $0x10] sm:$0xff] (!%p396_p2)  ;;  %s3009_s24 = smov (!%p396_p2), 104   ;;  %s3681_s20 = smov (!%p396_p2), 72  }
   0xb   : > { %v646_v58 = vpack.c.bf16 (!%p396_p2), %v641_v56, %v640_v55  ;;  %v643_v59 = vld [vmem:[%s3671_s8 + $0x18] sm:$0xff] (!%p396_p2)  ;;  %v2481_v13 = vld [vmem:[%s3669_s6] ss:$0 sm:$0xff] (!%p396_p2)  ;;  %v2502_v14 = vld [vmem:[%s3669_s6 + $0x1] ss:$0 sm:$0xff] (!%p396_p2) }
   0xc   : > { %2659 = vmatpush3.bf16.msra.mxu1 (!%p396_p2), %v464_v6  ;;  %v600_v46 = vsel (!%p396_p2), %vm599_vm3, %v598_v45, 0.0  ;;  %v647_v60 = vpack.c.bf16 (!%p396_p2), %v643_v59, %v642_v57 }
   0xd   : > { %s3683_s26 = smov (!%p441_p3, %s2468_s26), 1  ;;  %2660 = vmatprep.subr.bf16.mxu1 %v3000_v3  ;;  %2678 = vmatprep.subr.bf16.mxu0 %v646_v58 }
   0xe   : > { %s2556_s22 = sshll.u32 %s3683_s26, 4  ;;  %2679 = vmatpush3.bf16.msra.mxu0 %v646_v58  ;;  %s448_s18 = scalar_lea.vmem %s3664_s1, %s3683_s26 }
   0xf   : > { %s445_s27 = scalar_lea.vmem %s3663_s0, %s2556_s22  ;;  %2680 = vmatprep.subr.bf16.mxu0 %v647_v60  ;;  %s3007_s22 = smov 88  }
  0x10   : > { %v454_v10 = vld [vmem:[%s445_s27] sm:$0xff]  ;;  %v455_v11 = vld [vmem:[%s445_s27 + $0x8] sm:$0xff]  ;;  %2661 = vmatpush3.bf16.msra.mxu1 %v465_v9 }
  0x11   : > { %v462_v12 = vpack.c.bf16 %v455_v11, %v454_v10  ;;  %2666 = vmatprep.subr.bf16.mxu1 %v3000_v3  ;;  %v2480_v10 = vld [vmem:[%s3668_s5] ss:$0 sm:$0xff] }
  0x12   : > { %2681 = vmatpush3.bf16.msra.mxu0 %v647_v60 }
  0x13   : > { %2663 = vmatmul.mubr.msk.bf16.vlgmr.msra.gmra.mrb[0].mxu1 %vm466_vm1, %v462_v12  ;;  %2694 = vmatprep.subr.bf16.mxu0 %v3000_v3 }
  0x14   : > { %2674 = vmatprep.mubr.msk.bf16.mxu1 %vm3001_vm0, %v3000_v3  ;;  %2667 = vmatpush3.bf16.msra.mxu1 %v544_v16 }
  0x15   : > { %2668 = vmatprep.subr.bf16.mxu1 %v3000_v3 }
  0x18   : > { %2669 = vmatpush3.bf16.msra.mxu1 %v545_v18 }
  0x19   : > { %2670 = vmatprep.subr.bf16.mxu1 %v3000_v3 }
  0x1c   : > { %2671 = vmatpush3.bf16.msra.mxu1 %v546_v21 }
  0x1d   : > { %2672 = vmatprep.subr.bf16.mxu1 %v3000_v3 }
  0x20   : > { %2673 = vmatpush3.bf16.msra.mxu1 %v547_v24 }
  0x21   : > { %2686 = vmatprep.subr.bf16.mxu1 %v3000_v3 }
  0xe6   : > { %v504_v25 = vpop.f32.mrb[0].mxu1 }
  0xe7   : > { %527 = vrot.lane.b32.xlu0 %v504_v25, %s3002_s29  ;;  %v2664_v26 = vpop.f32.mrb[1].mxu1  ;;  %v2477_v29 = vmul.f32 -1.442695, %v504_v25 }
  0xe8   : > { %v507_v27 = vpop.f32.mrb[2].mxu1 }
  0xe9   : > { %v2665_v28 = vpop.f32.mrb[3].mxu1  ;;  %v2478_v30 = vmul.f32 -1.442695, %v507_v27  ;;  %2930 = vpow2.f32 %v2477_v29 }
  0xeb   : > { %529 = vrot.lane.b32.xlu0 %v507_v27, %s3002_s29  ;;  %2932 = vpow2.f32 %v2478_v30  ;;  %s3677_s29 = smov 72  }
  0xf3   : > { %v2931_v31 = vpop.eup %2930 }
  0xf4   : > { %v517_v33 = vadd.f32 1.0, %v2931_v31 }
  0xf5   : > { %v2933_v32 = vpop.eup %2932 }
  0xf6   : > { %v518_v34 = vadd.f32 1.0, %v2933_v32  ;;  %2934 = vrcp.f32 %v517_v33 }
  0xf8   : > { %2936 = vrcp.f32 %v518_v34 }
 0x100   : > { %v2935_v35 = vpop.eup %2934 }
 0x101   : > { %v523_v38 = vmul.f32 %v2935_v35, %v504_v25  ;;  %v766_v35 = vlaneseq }
 0x102   : > { %v2937_v36 = vpop.eup %2936 }
 0x103   : > { %v524_v39 = vmul.f32 %v2937_v36, %v507_v27  ;;  %v593_v36 = vld [vmem:[%s448_s18] sm:$0x1] }
 0x104   : > { %vm594_vm5 = vcmp.gt.f32.partialorder %v593_v36, 0.5 }
 0x10a   : > { %601 = vadd.xlane.f32.xlu0 %v600_v46 }
 0x159   : > { %v528_v37 = vpop.permute.xlu0 %527 }
 0x15a   : > { %v533_v41 = vmul.f32 %v528_v37, %v523_v38  ;;  %v767_v37 = vshrl.u32 %v766_v35, 7 }
 0x15c   : > { %v768_v38 = vsub.s32 0, %v767_v37 }
 0x15d   : > { %v530_v40 = vpop.permute.xlu0 %529 }
 0x15e   : > { %v534_v42 = vmul.f32 %v530_v40, %v524_v39  ;;  %v3005_v39 = vmov -1e+30  }
 0x15f   : > { %v595_v40 = vsel %vm594_vm5, 0.0, %v3005_v39 }
 0x160   : > { %v543_v43 = vpack.c.bf16 %v534_v42, %v533_v41  ;;  %v3219_v41 = vrot.slane %v595_v40, %v768_v38 }
 0x162   : > { %2675 = vmatmul.mubr.msk.bf16.vlgmr.msra.gmra.mrb[4].mxu1 %vm548_vm2, %v543_v43 }
 0x163   : > { %2690 = vmatprep.mubr.msk.bf16.mxu1 %vm3001_vm0, %v3000_v3 }
 0x197   : > { %v602_v61 = vpop.xlane.xlu0 %601 }
 0x198   : > { %v604_v62 = vmul.f32 0.03125, %v602_v61 }
 0x19a   : > { %v605_v63 = vadd.f32 1e-06, %v604_v62  ;;  %v702_v62 = vld [vmem:[%s3672_s9] sm:$0xff] }
 0x19c   : > { %2938 = vrsqrt.f32 %v605_v63  ;;  %v838_v63 = vpack.c.bf16 %v702_v62, %v702_v62 }
 0x1a6   : > { %v2939_v7 = vpop.eup %2938 }
 0x1a7   : > { %v607_v9 = vmul.f32 %v2939_v7, %v3155_v44 }
 0x1a9   : > { %v614_v15 = vmul.f32 %v2480_v10, %v607_v9 }
 0x1ab   : > { %v645_v21 = vpack.c.bf16 %v614_v15, %v614_v15 }
 0x235   : > { %v586_v47 = vpop.f32.mrb[4].mxu1 }
 0x236   : > { %v2676_v48 = vpop.f32.mrb[5].mxu1  ;;  %v616_v49 = vmul.f32 %v586_v47, %v586_v47 }
 0x237   : > { %v589_v50 = vpop.f32.mrb[6].mxu1 }
 0x238   : > { %v617_v51 = vmul.f32 %v589_v50, %v589_v50  ;;  %v2677_v52 = vpop.f32.mrb[7].mxu1  ;;  %v618_v53 = vsel %vm599_vm3, %v616_v49, 0.0 }
 0x239   : > { %619 = vadd.xlane.f32.xlu1 %v618_v53 }
 0x23a   : > { %v621_v54 = vsel %vm599_vm3, %v617_v51, 0.0 }
 0x23d   : > { %622 = vadd.xlane.f32.xlu1 %v621_v54 }
 0x2c6   : > { %v620_v0 = vpop.xlane.xlu1 %619 }
 0x2c7   : > { %v624_v1 = vmul.f32 0.03125, %v620_v0  ;;  %v993_v0 = vsel %vm793_vm7, %v838_v63, 0 }
 0x2c9   : > { %v626_v2 = vadd.f32 1e-06, %v624_v1 }
 0x2ca   : > { %v623_v4 = vpop.xlane.xlu1 %622 }
 0x2cb   : > { %2940 = vrsqrt.f32 %v626_v2  ;;  %v625_v5 = vmul.f32 0.03125, %v623_v4 }
 0x2cd   : > { %v627_v6 = vadd.f32 1e-06, %v625_v5 }
 0x2cf   : > { %2942 = vrsqrt.f32 %v627_v6 }
 0x2d5   : > { %v2941_v8 = vpop.eup %2940 }
 0x2d6   : > { %v630_v11 = vmul.f32 %v2941_v8, %v586_v47 }
 0x2d8   : > { %v638_v17 = vmul.f32 %v2481_v13, %v630_v11  ;;  %v3185_v19 = vmul.f32 %v2502_v14, %v630_v11 }
 0x2d9   : > { %v2943_v12 = vpop.eup %2942 }
 0x2da   : > { %v631_v16 = vmul.f32 %v2943_v12, %v589_v50 }
 0x2dc   : > { %v639_v18 = vmul.f32 %v2481_v13, %v631_v16  ;;  %v3187_v20 = vmul.f32 %v2502_v14, %v631_v16 }
 0x2de   : > { %v644_v22 = vpack.c.bf16 %v639_v18, %v638_v17  ;;  %v1535_v23 = vpack.c.bf16 %v3187_v20, %v3185_v19  ;;  %v1440_v19 = vld [vmem:[%s3674_s11 + $0x18] sm:$0xff] }
 0x2e0   : > { %2682 = vmatprep.mubr.msk.bf16.mxu0 %vm599_vm3, %v644_v22 }
 0x2e1   : > { %2683 = vmatmul.mubr.msk.bf16.vlgmr.msra.gmra.mrb[0].mxu0 %vm599_vm3, %v645_v21 }
 0x2e2   : > { %2698 = vmatprep.mubr.msk.bf16.mxu0 %vm3001_vm0, %v3000_v3 }
 0x3b4   : > { %v2684_v24 = vpop.f32.mrb[0].mxu0 }
 0x3b5   : > { %v688_v25 = vpop.f32.mrb[1].mxu0  ;;  %v3201_v29 = vpack.c.bf16 %v2684_v24, %v2684_v24 }
 0x3b6   : > { %v2685_v26 = vpop.f32.mrb[2].mxu0 }
 0x3b7   : > { %v691_v27 = vpop.f32.mrb[3].mxu0 }
 0x3b8   : > { %v3195_v28 = vpack.c.bf16 %v691_v27, %v688_v25  ;;  %v703_v27 = vld [vmem:[%s3672_s9 + $0x8] sm:$0xff] }
 0x3ba   : > { %785 = vrot.lane.b32.xlu0 %v3195_v28, %s3003_s14  ;;  %710 = vrot.lane.b32.xlu1 %v3195_v28, %s3004_s15 }
 0x3be   : > { %712 = vrot.lane.b32.xlu1 %v3201_v29, %s3004_s15 }
 0x42c   : > { %v786_v30 = vpop.permute.xlu0 %785  ;;  %v711_v31 = vpop.permute.xlu1 %710 }
 0x42d   : > { %v719_v32 = vsel %vm714_vm4, %v711_v31, 0  ;;  %2695 = vmatpush3.bf16.msra.mxu0 %v786_v30 }
 0x42e   : > { %2687 = vmatpush3.bf16.xpose.msra.mxu1 %v719_v32  ;;  %2696 = vmatprep.subr.bf16.mxu0 %v3000_v3 }
 0x42f   : > { %2688 = vmatprep.subr.bf16.mxu1 %v3000_v3 }
 0x430   : > { %v713_v33 = vpop.permute.xlu1 %712 }
 0x431   : > { %v722_v34 = vsel %vm714_vm4, %v713_v33, 0 }
 0x436   : > { %2689 = vmatpush3.bf16.xpose.msra.mxu1 %v722_v34 }
 0x437   : > { %2710 = vmatprep.subr.bf16.mxu1 %v3000_v3 }
 0x43d   : > { %2691 = vmatmul.mubr.msk.bf16.vlgmr.msra.gmra.mrb[8].mxu1 %vm714_vm4, %v3201_v29 }
 0x43e   : > { %2711 = vmatpush3.bf16.msra.mxu1 %v786_v30  ;;  %2714 = vmatprep.mubr.msk.bf16.mxu1 %vm3001_vm0, %v3000_v3  ;;  %v942_v30 = vpack.c.bf16 %v703_v27, %v703_v27 }
 0x43f   : > { %2712 = vmatprep.subr.bf16.mxu1 %v3000_v3 }
 0x510   : > { %v758_v42 = vpop.f32.mrb[8].mxu1 }
 0x511   : > { %v764_v43 = vmul.f32 0.35355338, %v758_v42  ;;  %v2692_v45 = vpop.f32.mrb[9].mxu1 }
 0x512   : > { %v761_v46 = vpop.f32.mrb[10].mxu1 }
 0x513   : > { %v2693_v47 = vpop.f32.mrb[11].mxu1  ;;  %v771_v48 = vadd.f32 %v3219_v41, %v764_v43 }
 0x515   : > { %v773_v49 = vsel %vm772_vm6, %v771_v48, -inf }
 0x516   : > { %774 = vmax.xlane.f32.xlu1 %v773_v49 }
 0x527   : > { %839 = vrot.lane.b32.xlu1 %v3201_v29, %s3006_s19 }
 0x5a3   : > { %v775_v50 = vpop.xlane.xlu1 %774 }
 0x5a4   : > { %v776_v51 = vsub.f32 %v771_v48, %v775_v50 }
 0x5a6   : > { %v777_v52 = vmul.f32 1.442695, %v776_v51 }
 0x5a7   : > { %v840_v61 = vpop.permute.xlu1 %839 }
 0x5a8   : > { %2944 = vpow2.f32 %v777_v52 }
 0x5b2   : > { %v2945_v53 = vpop.eup %2944 }
 0x5b3   : > { %v779_v54 = vsel %vm772_vm6, %v2945_v53, 0.0 }
 0x5b4   : > { %780 = vadd.xlane.f32.xlu0 %v779_v54 }
 0x5ca   : > { %787 = vrot.lane.b32.xlu0 %v3201_v29, %s3003_s14 }
 0x641   : > { %v781_v55 = vpop.xlane.xlu0 %780 }
 0x642   : > { %2946 = vrcp.f32 %v781_v55 }
 0x645   : > { %v788_v56 = vpop.permute.xlu0 %787 }
 0x646   : > { %v795_v57 = vsel %vm793_vm7, %v788_v56, 0 }
 0x647   : > { %2697 = vmatpush3.bf16.msra.mxu0 %v795_v57  ;;  %2713 = vmatpush3.bf16.msra.mxu1 %v795_v57 }
 0x648   : > { %2702 = vmatprep.subr.bf16.mxu0 %v3000_v3  ;;  %2718 = vmatprep.subr.bf16.mxu1 %v3000_v3 }
 0x64c   : > { %v2947_v58 = vpop.eup %2946 }
 0x64d   : > { %v783_v59 = vmul.f32 %v2947_v58, %v2945_v53 }
 0x64f   : > { %v784_v60 = vpack.c.bf16 %v783_v59, %v783_v59 }
 0x651   : > { %2699 = vmatmul.mubr.msk.bf16.vlgmr.msra.gmra.mrb[4].mxu0 %vm772_vm6, %v784_v60 }
 0x652   : > { %2703 = vmatpush3.bf16.xpose.msra.mxu0 %v719_v32  ;;  %2706 = vmatprep.mubr.msk.bf16.mxu0 %vm3001_vm0, %v3000_v3 }
 0x653   : > { %2704 = vmatprep.subr.bf16.mxu0 %v3000_v3 }
 0x65a   : > { %2705 = vmatpush3.bf16.xpose.msra.mxu0 %v722_v34  ;;  %v947_v34 = vsel %vm793_vm7, %v942_v30, 0 }
 0x65b   : > { %2724 = vmatprep.subr.bf16.mxu0 %v3000_v3 }
 0x661   : > { %2707 = vmatmul.mubr.msk.bf16.vlgmr.msra.gmra.mrb[8].mxu0 %vm714_vm4, %v840_v61 }
 0x662   : > { %2726 = vmatprep.mubr.msk.bf16.mxu0 %vm3001_vm0, %v3000_v3  ;;  %2725 = vmatpush3.bf16.msra.mxu0 %v993_v0 }
 0x663   : > { %2738 = vmatprep.subr.bf16.mxu0 %v3000_v3 }
 0x724   : > { %v831_v1 = vpop.f32.mrb[4].mxu0 }
 0x725   : > { %v837_v2 = vpack.c.bf16 %v831_v1, %v831_v1  ;;  %v2700_v4 = vpop.f32.mrb[5].mxu0 }
 0x726   : > { %v834_v5 = vpop.f32.mrb[6].mxu0 }
 0x727   : > { %v2701_v6 = vpop.f32.mrb[7].mxu0  ;;  %2727 = vmatmul.mubr.msk.bf16.vlgmr.msra.gmra.mrb[12].mxu0 %vm714_vm4, %v837_v2 }
 0x728   : > { %2742 = vmatprep.mubr.msk.bf16.mxu0 %vm3001_vm0, %v3000_v3 }
 0x734   : > { %v878_v7 = vpop.f32.mrb[8].mxu0 }
 0x735   : > { %v884_v8 = vmul.f32 0.35355338, %v878_v7  ;;  %v2708_v9 = vpop.f32.mrb[9].mxu0 }
 0x736   : > { %v881_v10 = vpop.f32.mrb[10].mxu0 }
 0x737   : > { %v2709_v11 = vpop.f32.mrb[11].mxu0  ;;  %v885_v12 = vadd.f32 %v884_v8, %v3219_v41 }
 0x739   : > { %v886_v13 = vsel %vm772_vm6, %v885_v12, -inf }
 0x73a   : > { %887 = vmax.xlane.f32.xlu0 %v886_v13 }
 0x750   : > { %1037 = vrot.lane.b32.xlu0 %v3195_v28, %s3007_s22 }
 0x754   : > { %1035 = vrot.lane.b32.xlu0 %v3201_v29, %s3679_s23 }
 0x758   : > { %1204 = vrot.lane.b32.xlu0 %v3201_v29, %s3009_s24 }
 0x7c7   : > { %v888_v14 = vpop.xlane.xlu0 %887 }
 0x7c8   : > { %v889_v15 = vsub.f32 %v885_v12, %v888_v14 }
 0x7ca   : > { %v890_v16 = vmul.f32 1.442695, %v889_v15 }
 0x7cb   : > { %v1038_v35 = vpop.permute.xlu0 %1037 }
 0x7cc   : > { %2948 = vpow2.f32 %v890_v16  ;;  %v1045_v40 = vsel %vm714_vm4, %v1038_v35, 0 }
 0x7cf   : > { %v1036_v46 = vpop.permute.xlu0 %1035 }
 0x7d3   : > { %v1205_v47 = vpop.permute.xlu0 %1204 }
 0x7d6   : > { %v2949_v17 = vpop.eup %2948 }
 0x7d7   : > { %v892_v18 = vsel %vm772_vm6, %v2949_v17, 0.0 }
 0x7d8   : > { %893 = vadd.xlane.f32.xlu1 %v892_v18 }
 0x7e9   : > { %1039 = vrot.lane.b32.xlu1 %v3201_v29, %s3007_s22 }
 0x7fa   : > { %v1029_v21 = vpop.f32.mrb[12].mxu0 }
 0x7fb   : > { %v2728_v22 = vpop.f32.mrb[13].mxu0 }
 0x7fc   : > { %v1032_v24 = vpop.f32.mrb[14].mxu0 }
 0x7fd   : > { %v2729_v25 = vpop.f32.mrb[15].mxu0 }
 0x865   : > { %v894_v26 = vpop.xlane.xlu1 %893 }
 0x866   : > { %2950 = vrcp.f32 %v894_v26 }
 0x869   : > { %v1040_v43 = vpop.permute.xlu1 %1039 }
 0x86a   : > { %v1048_v45 = vsel %vm714_vm4, %v1040_v43, 0 }
 0x870   : > { %v2951_v31 = vpop.eup %2950 }
 0x871   : > { %v896_v32 = vmul.f32 %v2951_v31, %v2949_v17 }
 0x873   : > { %v897_v33 = vpack.c.bf16 %v896_v32, %v896_v32 }
 0x875   : > { %2715 = vmatmul.mubr.msk.bf16.vlgmr.msra.gmra.mrb[12].mxu1 %vm772_vm6, %v897_v33 }
 0x876   : > { %2719 = vmatpush3.bf16.msra.mxu1 %v947_v34  ;;  %2720 = vmatprep.mubr.msk.bf16.mxu1 %vm3001_vm0, %v3000_v3 }
 0x877   : > { %2730 = vmatprep.subr.bf16.mxu1 %v3000_v3 }
 0x948   : > { %v935_v36 = vpop.f32.mrb[12].mxu1 }
 0x949   : > { %v941_v37 = vpack.c.bf16 %v935_v36, %v935_v36  ;;  %v2716_v38 = vpop.f32.mrb[13].mxu1  ;;  %v705_v36 = vld [vmem:[%s3672_s9 + $0x18] sm:$0xff] }
 0x94a   : > { %v938_v39 = vpop.f32.mrb[14].mxu1 }
 0x94b   : > { %v2717_v42 = vpop.f32.mrb[15].mxu1  ;;  %2721 = vmatmul.mubr.msk.bf16.vlgmr.msra.gmra.mrb[16].mxu1 %vm714_vm4, %v941_v37  ;;  %v1307_v37 = vpack.c.bf16 %v705_v36, %v705_v36 }
 0x94c   : > { %2731 = vmatpush3.bf16.xpose.msra.mxu1 %v1045_v40  ;;  %2734 = vmatprep.mubr.msk.bf16.mxu1 %vm3001_vm0, %v3000_v3 }
 0x94d   : > { %2732 = vmatprep.subr.bf16.mxu1 %v3000_v3  ;;  %v1312_v38 = vsel %vm793_vm7, %v1307_v37, 0  ;;  %v1451_v37 = vld [vmem:[%s3674_s11 + $0x70] sm:$0xff] }
 0x954   : > { %2733 = vmatpush3.bf16.xpose.msra.mxu1 %v1048_v45 }
 0x955   : > { %2752 = vmatprep.subr.bf16.mxu1 %v3000_v3 }
 0x95b   : > { %2735 = vmatmul.mubr.msk.bf16.vlgmr.msra.gmra.mrb[20].mxu1 %vm714_vm4, %v1036_v46 }
 0x95c   : > { %2753 = vmatpush3.bf16.xpose.msra.mxu1 %v1045_v40  ;;  %2756 = vmatprep.mubr.msk.bf16.mxu1 %vm3001_vm0, %v3000_v3 }
 0x95d   : > { %2754 = vmatprep.subr.bf16.mxu1 %v3000_v3 }
 0x964   : > { %2755 = vmatpush3.bf16.xpose.msra.mxu1 %v1048_v45 }
 0x96b   : > { %2757 = vmatmul.mubr.msk.bf16.vlgmr.msra.gmra.mrb[24].mxu1 %vm714_vm4, %v1205_v47 }
 0xa1e   : > { %v983_v48 = vpop.f32.mrb[16].mxu1 }
 0xa1f   : > { %v3278_v49 = vadd.f32 %v1029_v21, %v983_v48  ;;  %v2722_v50 = vpop.f32.mrb[17].mxu1 }
 0xa20   : > { %v986_v51 = vpop.f32.mrb[18].mxu1 }
 0xa21   : > { %v2723_v52 = vpop.f32.mrb[19].mxu1 }
 0xa2e   : > { %v1084_v53 = vpop.f32.mrb[20].mxu1 }
 0xa2f   : > { %v1090_v54 = vmul.f32 0.35355338, %v1084_v53  ;;  %v2736_v55 = vpop.f32.mrb[21].mxu1 }
 0xa30   : > { %v1087_v56 = vpop.f32.mrb[22].mxu1 }
 0xa31   : > { %v2737_v57 = vpop.f32.mrb[23].mxu1  ;;  %v1091_v58 = vadd.f32 %v1090_v54, %v3219_v41 }
 0xa33   : > { %v1092_v59 = vsel %vm772_vm6, %v1091_v58, -inf }
 0xa34   : > { %1093 = vmax.xlane.f32.xlu0 %v1092_v59  ;;  %v1373_v59 = vld [vmem:[%s3673_s10 + $0x8] sm:$0xff] }
 0xa3e   : > { %v1243_v60 = vpop.f32.mrb[24].mxu1 }
 0xa3f   : > { %v2758_v61 = vpop.f32.mrb[25].mxu1  ;;  %v1249_v0 = vmul.f32 0.35355338, %v1243_v60  ;;  %v1375_v60 = vld [vmem:[%s3673_s10 + $0x18] sm:$0xff] }
 0xa40   : > { %v1246_v62 = vpop.f32.mrb[26].mxu1  ;;  %v1382_v61 = vpack.c.bf16 %v1375_v60, %v1373_v59 }
 0xa41   : > { %v2759_v63 = vpop.f32.mrb[27].mxu1  ;;  %v1250_v1 = vadd.f32 %v1249_v0, %v3219_v41  ;;  %v1374_v62 = vld [vmem:[%s3673_s10 + $0x10] sm:$0xff]  ;;  %v1377_v0 = vld [vmem:[%s3673_s10 + $0x28] sm:$0xff] }
 0xa42   : > { %1388 = vmatprep.subr.bf16.mxu1 %v1382_v61  ;;  %v2503_v61 = vld [vmem:[%s3671_s8 + $0x20] sm:$0xff] }
 0xa43   : > { %v1251_v2 = vsel %vm772_vm6, %v1250_v1, -inf }
 0xa4a   : > { %1104 = vrot.lane.b32.xlu0 %v3195_v28, %s3677_s29 }
 0xa69   : > { %1252 = vmax.xlane.f32.xlu0 %v1251_v2  ;;  %v1376_v2 = vld [vmem:[%s3673_s10 + $0x20] sm:$0xff] }
 0xac1   : > { %v1094_v4 = vpop.xlane.xlu0 %1093 }
 0xac2   : > { %v1095_v5 = vsub.f32 %v1091_v58, %v1094_v4 }
 0xac4   : > { %v1096_v6 = vmul.f32 1.442695, %v1095_v5  ;;  %v1378_v5 = vld [vmem:[%s3673_s10 + $0x30] sm:$0xff] }
 0xac5   : > { %v1105_v7 = vpop.permute.xlu0 %1104 }
 0xac6   : > { %2952 = vpow2.f32 %v1096_v6  ;;  %2739 = vmatpush3.bf16.msra.mxu0 %v1105_v7  ;;  %v3011_v6 = vmov 0  }
 0xac7   : > { %2740 = vmatprep.subr.bf16.mxu0 %v3000_v3  ;;  %1420 = vmatprep.mubr.bf16.mxu1 %v3011_v6 }
 0xad0   : > { %v2953_v8 = vpop.eup %2952 }
 0xad1   : > { %v1098_v9 = vsel %vm772_vm6, %v2953_v8, 0.0 }
 0xad2   : > { %1099 = vadd.xlane.f32.xlu1 %v1098_v9 }
 0xae3   : > { %1106 = vrot.lane.b32.xlu1 %v3201_v29, %s3677_s29  ;;  %v704_v29 = vld [vmem:[%s3672_s9 + $0x10] sm:$0xff] }
 0xae4   : > { %v1156_v17 = vpack.c.bf16 %v704_v29, %v704_v29 }
 0xae6   : > { %v1161_v24 = vsel %vm793_vm7, %v1156_v17, 0  ;;  %v1439_v17 = vld [vmem:[%s3674_s11 + $0x10] sm:$0xff] }
 0xae7   : > { %v1455_v20 = vpack.c.bf16 %v1440_v19, %v1439_v17 }
 0xaf6   : > { %v1253_v28 = vpop.xlane.xlu0 %1252 }
 0xaf7   : > { %v1254_v10 = vsub.f32 %v1250_v1, %v1253_v28  ;;  %v1379_v1 = vld [vmem:[%s3673_s10 + $0x38] sm:$0xff] }
 0xaf8   : > { %v1384_v4 = vpack.c.bf16 %v1379_v1, %v1377_v0 }
 0xaf9   : > { %v1255_v11 = vmul.f32 1.442695, %v1254_v10 }
 0xafb   : > { %2954 = vpow2.f32 %v1255_v11  ;;  %v2496_v11 = vld [vmem:[%s3670_s7] ss:$0 sm:$0xff] }
 0xb05   : > { %v2955_v12 = vpop.eup %2954 }
 0xb06   : > { %v1257_v13 = vsel %vm772_vm6, %v2955_v12, 0.0 }
 0xb07   : > { %1258 = vadd.xlane.f32.xlu1 %v1257_v13 }
 0xb5f   : > { %v1100_v14 = vpop.xlane.xlu1 %1099 }
 0xb60   : > { %2956 = vrcp.f32 %v1100_v14 }
 0xb63   : > { %v1107_v15 = vpop.permute.xlu1 %1106 }
 0xb64   : > { %v1113_v16 = vsel %vm793_vm7, %v1107_v15, 0  ;;  %v1437_v15 = vld [vmem:[%s3674_s11] sm:$0xff] }
 0xb65   : > { %2741 = vmatpush3.bf16.msra.mxu0 %v1113_v16 }
 0xb66   : > { %2746 = vmatprep.subr.bf16.mxu0 %v3000_v3 }
 0xb6a   : > { %v2957_v18 = vpop.eup %2956 }
 0xb6b   : > { %v1102_v21 = vmul.f32 %v2957_v18, %v2953_v8  ;;  %v1442_v18 = vld [vmem:[%s3674_s11 + $0x28] sm:$0xff] }
 0xb6d   : > { %v1103_v22 = vpack.c.bf16 %v1102_v21, %v1102_v21 }
 0xb6f   : > { %2743 = vmatmul.mubr.msk.bf16.vlgmr.msra.gmra.mrb[16].mxu0 %vm772_vm6, %v1103_v22  ;;  %v1443_v22 = vld [vmem:[%s3674_s11 + $0x30] sm:$0xff] }
 0xb70   : > { %2747 = vmatpush3.bf16.msra.mxu0 %v1161_v24  ;;  %2748 = vmatprep.mubr.msk.bf16.mxu0 %vm3001_vm0, %v3000_v3  ;;  %v1444_v24 = vld [vmem:[%s3674_s11 + $0x38] sm:$0xff] }
 0xb71   : > { %2760 = vmatprep.subr.bf16.mxu0 %v3000_v3 }
 0xb94   : > { %v1259_v25 = vpop.xlane.xlu1 %1258 }
 0xb95   : > { %2958 = vrcp.f32 %v1259_v25  ;;  %v1457_v25 = vpack.c.bf16 %v1444_v24, %v1443_v22 }
 0xb9f   : > { %v2959_v31 = vpop.eup %2958 }
 0xba0   : > { %v1261_v34 = vmul.f32 %v2959_v31, %v2955_v12  ;;  %v1447_v31 = vld [vmem:[%s3674_s11 + $0x50] sm:$0xff] }
 0xba2   : > { %v1262_v35 = vpack.c.bf16 %v1261_v34, %v1261_v34  ;;  %v1449_v34 = vld [vmem:[%s3674_s11 + $0x60] sm:$0xff] }
 0xc42   : > { %v1149_v26 = vpop.f32.mrb[16].mxu0 }
 0xc43   : > { %v1155_v27 = vpack.c.bf16 %v1149_v26, %v1149_v26  ;;  %v2744_v30 = vpop.f32.mrb[17].mxu0  ;;  %v1445_v26 = vld [vmem:[%s3674_s11 + $0x40] sm:$0xff] }
 0xc44   : > { %v1152_v32 = vpop.f32.mrb[18].mxu0 }
 0xc45   : > { %v2745_v33 = vpop.f32.mrb[19].mxu0  ;;  %2749 = vmatmul.mubr.msk.bf16.vlgmr.msra.gmra.mrb[20].mxu0 %vm714_vm4, %v1155_v27  ;;  %v1446_v27 = vld [vmem:[%s3674_s11 + $0x48] sm:$0xff]  ;;  %v1448_v32 = vld [vmem:[%s3674_s11 + $0x58] sm:$0xff] }
 0xc46   : > { %2761 = vmatpush3.bf16.msra.mxu0 %v1105_v7  ;;  %2764 = vmatprep.mubr.msk.bf16.mxu0 %vm3001_vm0, %v3000_v3  ;;  %v1383_v7 = vpack.c.bf16 %v1378_v5, %v1376_v2  ;;  %v1458_v30 = vpack.c.bf16 %v1446_v27, %v1445_v26  ;;  %v1459_v33 = vpack.c.bf16 %v1448_v32, %v1447_v31 }
 0xc47   : > { %2762 = vmatprep.subr.bf16.mxu0 %v3000_v3 }
 0xc4a   : > { %2763 = vmatpush3.bf16.msra.mxu0 %v1113_v16  ;;  %v1438_v16 = vld [vmem:[%s3674_s11 + $0x8] sm:$0xff] }
 0xc4b   : > { %2768 = vmatprep.subr.bf16.mxu0 %v3000_v3  ;;  %v1454_v29 = vpack.c.bf16 %v1438_v16, %v1437_v15 }
 0xc4d   : > { %2765 = vmatmul.mubr.msk.bf16.vlgmr.msra.gmra.mrb[24].mxu0 %vm772_vm6, %v1262_v35  ;;  %v1450_v35 = vld [vmem:[%s3674_s11 + $0x68] sm:$0xff] }
 0xc4e   : > { %2770 = vmatprep.mubr.msk.bf16.mxu0 %vm3001_vm0, %v3000_v3  ;;  %2769 = vmatpush3.bf16.msra.mxu0 %v1312_v38  ;;  %v1460_v36 = vpack.c.bf16 %v1450_v35, %v1449_v34  ;;  %v1452_v38 = vld [vmem:[%s3674_s11 + $0x78] sm:$0xff] }
 0xc4f   : > { %2774 = vmatprep.subr.bf16.mxu0 %v3000_v3 }
 0xd18   : > { %v1197_v39 = vpop.f32.mrb[20].mxu0 }
 0xd19   : > { %v1203_v40 = vadd.f32 %v1197_v39, %v3278_v49  ;;  %v2750_v42 = vpop.f32.mrb[21].mxu0  ;;  %v1461_v39 = vpack.c.bf16 %v1452_v38, %v1451_v37 }
 0xd1a   : > { %v1200_v43 = vpop.f32.mrb[22].mxu0 }
 0xd1b   : > { %v2751_v45 = vpop.f32.mrb[23].mxu0 }
 0xd20   : > { %v1300_v46 = vpop.f32.mrb[24].mxu0 }
 0xd21   : > { %v1306_v47 = vpack.c.bf16 %v1300_v46, %v1300_v46  ;;  %v2766_v48 = vpop.f32.mrb[25].mxu0 }
 0xd22   : > { %v1303_v50 = vpop.f32.mrb[26].mxu0 }
 0xd23   : > { %v2767_v51 = vpop.f32.mrb[27].mxu0  ;;  %2771 = vmatmul.mubr.msk.bf16.vlgmr.msra.gmra.mrb[28].mxu0 %vm714_vm4, %v1306_v47 }
 0xd24   : > { %2790 = vmatprep.mubr.msk.bf16.mxu0 %vm3001_vm0, %v3000_v3  ;;  %2775 = vmatpush3.bf16.msra.mxu0 %v1454_v29 }
 0xd25   : > { %2776 = vmatprep.subr.bf16.mxu0 %v3000_v3 }
 0xd28   : > { %2777 = vmatpush3.bf16.msra.mxu0 %v1455_v20 }
 0xd29   : > { %2778 = vmatprep.subr.bf16.mxu0 %v3000_v3 }
 0xdf6   : > { %v1348_v52 = vpop.f32.mrb[28].mxu0 }
 0xdf7   : > { %v1354_v53 = vadd.f32 %v1348_v52, %v1203_v40  ;;  %v2772_v54 = vpop.f32.mrb[29].mxu0 }
 0xdf8   : > { %v1351_v55 = vpop.f32.mrb[30].mxu0 }
 0xdf9   : > { %v3319_v56 = vadd.f32 %v1354_v53, %v3155_v44  ;;  %v2773_v49 = vpop.f32.mrb[31].mxu0  ;;  %v1372_v44 = vld [vmem:[%s3673_s10] sm:$0xff] }
 0xdfa   : > { %v1381_v63 = vpack.c.bf16 %v1374_v62, %v1372_v44  ;;  %v2504_v44 = vld [vmem:[%s3671_s8 + $0x28] sm:$0xff] }
 0xdfb   : > { %v1357_v57 = vmul.f32 %v3319_v56, %v3319_v56  ;;  %v1537_v62 = vpack.c.bf16 %v2504_v44, %v2503_v61  ;;  %v2509_v61 = vld [vmem:[%s3672_s9 + $0x20] sm:$0xff] }
 0xdfc   : > { %1389 = vmatpush1.bf16.msra.mxu1 %v1381_v63  ;;  %v2506_v63 = vld [vmem:[%s3671_s8 + $0x38] sm:$0xff]  ;;  %v1721_v44 = vpack.c.bf16 %v2509_v61, %v2509_v61 }
 0xdfd   : > { %v1358_v58 = vsel %vm599_vm3, %v1357_v57, 0.0  ;;  %1390 = vmatprep.subr.bf16.mxu1 %v1384_v4 }
 0xdfe   : > { %1359 = vadd.xlane.f32.xlu0 %v1358_v58 }
 0xe00   : > { %1391 = vmatpush1.bf16.msra.mxu1 %v1383_v7  ;;  %v2500_v7 = vld [vmem:[%s3668_s5 + $0x1] ss:$0 sm:$0xff] }
 0xe01   : > { %2794 = vmatprep.subr.bf16.mxu1 %v1537_v62 }
 0xe8b   : > { %v1360_v8 = vpop.xlane.xlu0 %1359 }
 0xe8c   : > { %v1361_v9 = vmul.f32 0.03125, %v1360_v8 }
 0xe8e   : > { %v1362_v28 = vadd.f32 1e-06, %v1361_v9 }
 0xe90   : > { %2960 = vrsqrt.f32 %v1362_v28 }
 0xe9a   : > { %v2961_v10 = vpop.eup %2960 }
 0xe9b   : > { %v1364_v12 = vmul.f32 %v2961_v10, %v3319_v56 }
 0xe9d   : > { %v1371_v13 = vmul.f32 %v2496_v11, %v1364_v12 }
 0xe9f   : > { %v1380_v14 = vpack.c.bf16 %v1371_v13, %v1371_v13 }
 0xea1   : > { %2497 = vmatmul.mubr.msk.bf16.vlgmr.msra.gmra.mrb[28].mxu1 %vm599_vm3, %v1380_v14 }
 0xea2   : > { %2798 = vmatprep.mubr.msk.bf16.mxu1 %vm599_vm3, %v1535_v23  ;;  %v1441_v23 = vld [vmem:[%s3674_s11 + $0x20] sm:$0xff]  ;;  %2795 = vmatpush3.bf16.msra.mxu1 %v1537_v62  ;;  %v2510_v62 = vld [vmem:[%s3672_s9 + $0x28] sm:$0xff] }
 0xea3   : > { %v1456_v21 = vpack.c.bf16 %v1442_v18, %v1441_v23 }
 0xea5   : > { %2779 = vmatpush3.bf16.msra.mxu0 %v1456_v21 }
 0xea6   : > { %2780 = vmatprep.subr.bf16.mxu0 %v3000_v3 }
 0xea9   : > { %2781 = vmatpush3.bf16.msra.mxu0 %v1457_v25 }
 0xeaa   : > { %2782 = vmatprep.subr.bf16.mxu0 %v3000_v3 }
 0xead   : > { %2783 = vmatpush3.bf16.msra.mxu0 %v1458_v30 }
 0xeae   : > { %2784 = vmatprep.subr.bf16.mxu0 %v3000_v3 }
 0xeb1   : > { %2785 = vmatpush3.bf16.msra.mxu0 %v1459_v33 }
 0xeb2   : > { %2786 = vmatprep.subr.bf16.mxu0 %v3000_v3 }
 0xeb5   : > { %2787 = vmatpush3.bf16.msra.mxu0 %v1460_v36 }
 0xeb6   : > { %2788 = vmatprep.subr.bf16.mxu0 %v3000_v3 }
 0xeb9   : > { %2789 = vmatpush3.bf16.msra.mxu0 %v1461_v39 }
 0xeba   : > { %2818 = vmatprep.subr.bf16.mxu0 %v3000_v3 }
 0xf74   : > { %v1422_v40 = vpop.f32.mrb[28].mxu1 }
 0xf75   : > { %v2498_v42 = vmul.f32 -1.442695, %v1422_v40  ;;  %v1424_v43 = vpop.f32.mrb[29].mxu1 }
 0xf76   : > { %v1426_v45 = vpop.f32.mrb[30].mxu1 }
 0xf77   : > { %2962 = vpow2.f32 %v2498_v42  ;;  %v1427_v46 = vpop.f32.mrb[31].mxu1 }
 0xf81   : > { %v2963_v47 = vpop.eup %2962 }
 0xf82   : > { %v1432_v48 = vadd.f32 1.0, %v2963_v47 }
 0xf84   : > { %2964 = vrcp.f32 %v1432_v48 }
 0xf8e   : > { %v2965_v50 = vpop.eup %2964 }
 0xf8f   : > { %v1435_v51 = vmul.f32 %v2965_v50, %v1422_v40 }
 0xf91   : > { %v1436_v52 = vmul.f32 %v1435_v51, %v1424_v43 }
 0xf93   : > { %v1453_v53 = vpack.c.bf16 %v1436_v52, %v1436_v52 }
 0xf95   : > { %2791 = vmatmul.mubr.bf16.vlgmr.msra.gmra.mrb[32].mxu0 %v1453_v53 }
 0xf96   : > { %2822 = vmatprep.mubr.msk.bf16.mxu0 %vm3001_vm0, %v3000_v3 }
0x1068   : > { %v1496_v54 = vpop.f32.mrb[32].mxu0 }
0x1069   : > { %v3417_v55 = vadd.f32 %v1496_v54, %v3319_v56  ;;  %v2792_v49 = vpop.f32.mrb[33].mxu0  ;;  %v2505_v56 = vld [vmem:[%s3671_s8 + $0x30] sm:$0xff] }
0x106a   : > { %v1499_v57 = vpop.f32.mrb[34].mxu0  ;;  %v1538_v0 = vpack.c.bf16 %v2506_v63, %v2505_v56  ;;  %v1876_v56 = vsel %vm793_vm7, %v1721_v44, 0  ;;  %v1825_v63 = vpack.c.bf16 %v2510_v62, %v2510_v62 }
0x106b   : > { %v2793_v58 = vpop.f32.mrb[35].mxu0  ;;  %v1505_v59 = vmul.f32 %v3417_v55, %v3417_v55 }
0x106c   : > { %2796 = vmatprep.subr.bf16.mxu1 %v1538_v0 }
0x106d   : > { %v1506_v60 = vsel %vm599_vm3, %v1505_v59, 0.0  ;;  %2797 = vmatpush3.bf16.msra.mxu1 %v1538_v0  ;;  %v1830_v0 = vsel %vm793_vm7, %v1825_v63, 0 }
0x106e   : > { %1507 = vadd.xlane.f32.xlu0 %v1506_v60  ;;  %2802 = vmatprep.subr.bf16.mxu1 %v3000_v3 }
0x10fb   : > { %v1508_v1 = vpop.xlane.xlu0 %1507 }
0x10fc   : > { %v1509_v2 = vmul.f32 0.03125, %v1508_v1 }
0x10fe   : > { %v1510_v4 = vadd.f32 1e-06, %v1509_v2 }
0x1100   : > { %2966 = vrsqrt.f32 %v1510_v4 }
0x110a   : > { %v2967_v5 = vpop.eup %2966 }
0x110b   : > { %v1512_v8 = vmul.f32 %v2967_v5, %v3417_v55 }
0x110d   : > { %v1519_v9 = vmul.f32 %v2500_v7, %v1512_v8 }
0x110f   : > { %v1536_v28 = vpack.c.bf16 %v1519_v9, %v1519_v9 }
0x1111   : > { %2799 = vmatmul.mubr.msk.bf16.vlgmr.msra.gmra.mrb[32].mxu1 %vm599_vm3, %v1536_v28 }
0x1112   : > { %2806 = vmatprep.mubr.msk.bf16.mxu1 %vm3001_vm0, %v3000_v3 }
0x11e4   : > { %v2800_v10 = vpop.f32.mrb[32].mxu1 }
0x11e5   : > { %v3442_v11 = vpack.c.bf16 %v2800_v10, %v2800_v10  ;;  %v1579_v12 = vpop.f32.mrb[33].mxu1 }
0x11e6   : > { %v2801_v13 = vpop.f32.mrb[34].mxu1 }
0x11e7   : > { %1604 = vrot.lane.b32.xlu1 %v3442_v11, %s3004_s15  ;;  %v1582_v14 = vpop.f32.mrb[35].mxu1 }
0x11e8   : > { %v3446_v15 = vpack.c.bf16 %v1582_v14, %v1579_v12 }
0x11ea   : > { %1602 = vrot.lane.b32.xlu0 %v3446_v15, %s3004_s15  ;;  %s3680_s15 = smov 112  }
0x11eb   : > { %1722 = vrot.lane.b32.xlu1 %v3442_v11, %s3006_s19 }
0x1259   : > { %v1605_v17 = vpop.permute.xlu1 %1604 }
0x125a   : > { %v1613_v19 = vsel %vm714_vm4, %v1605_v17, 0 }
0x125c   : > { %v1603_v16 = vpop.permute.xlu0 %1602 }
0x125d   : > { %v1610_v29 = vsel %vm714_vm4, %v1603_v16, 0  ;;  %v1723_v20 = vpop.permute.xlu1 %1722 }
0x125e   : > { %2803 = vmatpush3.bf16.xpose.msra.mxu1 %v1610_v29  ;;  %2819 = vmatpush3.bf16.xpose.msra.mxu0 %v1610_v29 }
0x125f   : > { %2804 = vmatprep.subr.bf16.mxu1 %v3000_v3  ;;  %2820 = vmatprep.subr.bf16.mxu0 %v3000_v3 }
0x1266   : > { %2805 = vmatpush3.bf16.xpose.msra.mxu1 %v1613_v19  ;;  %2821 = vmatpush3.bf16.xpose.msra.mxu0 %v1613_v19 }
0x1267   : > { %2810 = vmatprep.subr.bf16.mxu1 %v3000_v3  ;;  %2840 = vmatprep.subr.bf16.mxu0 %v3000_v3 }
0x126d   : > { %2807 = vmatmul.mubr.msk.bf16.vlgmr.msra.gmra.mrb[36].mxu1 %vm714_vm4, %v3442_v11  ;;  %2823 = vmatmul.mubr.msk.bf16.vlgmr.msra.gmra.mrb[36].mxu0 %vm714_vm4, %v1723_v20 }
0x126e   : > { %2814 = vmatprep.mubr.msk.bf16.mxu1 %vm3001_vm0, %v3000_v3  ;;  %2842 = vmatprep.mubr.msk.bf16.mxu0 %vm3001_vm0, %v3000_v3 }
0x126f   : > { %2841 = vmatpush3.bf16.msra.mxu0 %v1876_v56 }
0x1270   : > { %2854 = vmatprep.subr.bf16.mxu0 %v3000_v3 }
0x1340   : > { %v1649_v23 = vpop.f32.mrb[36].mxu1  ;;  %v1761_v18 = vpop.f32.mrb[36].mxu0 }
0x1341   : > { %v1655_v21 = vmul.f32 0.35355338, %v1649_v23  ;;  %v1767_v22 = vmul.f32 0.35355338, %v1761_v18  ;;  %v2808_v24 = vpop.f32.mrb[37].mxu1  ;;  %v2824_v25 = vpop.f32.mrb[37].mxu0 }
0x1342   : > { %v1652_v26 = vpop.f32.mrb[38].mxu1  ;;  %v1764_v27 = vpop.f32.mrb[38].mxu0 }
0x1343   : > { %v2809_v30 = vpop.f32.mrb[39].mxu1  ;;  %v2825_v31 = vpop.f32.mrb[39].mxu0  ;;  %v1768_v32 = vadd.f32 %v1767_v22, %v3219_v41  ;;  %v1656_v33 = vadd.f32 %v1655_v21, %v3219_v41 }
0x1345   : > { %v1769_v34 = vsel %vm772_vm6, %v1768_v32, -inf  ;;  %v1657_v35 = vsel %vm772_vm6, %v1656_v33, -inf }
0x1346   : > { %1770 = vmax.xlane.f32.xlu1 %v1769_v34  ;;  %1658 = vmax.xlane.f32.xlu0 %v1657_v35 }
0x1357   : > { %1669 = vrot.lane.b32.xlu1 %v3446_v15, %s3003_s14 }
0x135b   : > { %1920 = vrot.lane.b32.xlu1 %v3446_v15, %s3007_s22 }
0x135f   : > { %1922 = vrot.lane.b32.xlu1 %v3442_v11, %s3007_s22 }
0x1363   : > { %2087 = vrot.lane.b32.xlu1 %v3442_v11, %s3009_s24 }
0x13d3   : > { %v1771_v36 = vpop.xlane.xlu1 %1770  ;;  %v1659_v37 = vpop.xlane.xlu0 %1658 }
0x13d4   : > { %v1772_v38 = vsub.f32 %v1768_v32, %v1771_v36  ;;  %v1660_v39 = vsub.f32 %v1656_v33, %v1659_v37 }
0x13d6   : > { %v1661_v40 = vmul.f32 1.442695, %v1660_v39  ;;  %v1773_v42 = vmul.f32 1.442695, %v1772_v38 }
0x13d7   : > { %v1670_v43 = vpop.permute.xlu1 %1669 }
0x13d8   : > { %2811 = vmatpush3.bf16.msra.mxu1 %v1670_v43  ;;  %2968 = vpow2.f32 %v1661_v40 }
0x13d9   : > { %2812 = vmatprep.subr.bf16.mxu1 %v3000_v3  ;;  %2970 = vpow2.f32 %v1773_v42 }
0x13db   : > { %v1921_v8 = vpop.permute.xlu1 %1920 }
0x13dc   : > { %v1928_v13 = vsel %vm714_vm4, %v1921_v8, 0 }
0x13df   : > { %v1923_v16 = vpop.permute.xlu1 %1922 }
0x13e0   : > { %v1931_v29 = vsel %vm714_vm4, %v1923_v16, 0 }
0x13e2   : > { %v2969_v45 = vpop.eup %2968 }
0x13e3   : > { %v1663_v46 = vsel %vm772_vm6, %v2969_v45, 0.0  ;;  %v2971_v47 = vpop.eup %2970  ;;  %v2088_v19 = vpop.permute.xlu1 %2087 }
0x13e4   : > { %1664 = vadd.xlane.f32.xlu0 %v1663_v46  ;;  %v1775_v48 = vsel %vm772_vm6, %v2971_v47, 0.0 }
0x13e8   : > { %1776 = vadd.xlane.f32.xlu0 %v1775_v48 }
0x13fe   : > { %1671 = vrot.lane.b32.xlu0 %v3442_v11, %s3003_s14 }
0x1402   : > { %1918 = vrot.lane.b32.xlu0 %v3442_v11, %s3680_s15  ;;  %s2475_s15 = sshll.u32 %s3683_s26, 3 }
0x1471   : > { %v1665_v50 = vpop.xlane.xlu0 %1664 }
0x1472   : > { %2972 = vrcp.f32 %v1665_v50 }
0x1475   : > { %v1777_v51 = vpop.xlane.xlu0 %1776 }
0x1476   : > { %2974 = vrcp.f32 %v1777_v51 }
0x1479   : > { %v1672_v52 = vpop.permute.xlu0 %1671 }
0x147a   : > { %v1678_v53 = vsel %vm793_vm7, %v1672_v52, 0 }
0x147b   : > { %2813 = vmatpush3.bf16.msra.mxu1 %v1678_v53 }
0x147c   : > { %v2973_v54 = vpop.eup %2972  ;;  %2826 = vmatprep.subr.bf16.mxu1 %v3000_v3 }
0x147d   : > { %v1667_v49 = vmul.f32 %v2973_v54, %v2969_v45  ;;  %v1919_v17 = vpop.permute.xlu0 %1918 }
0x147f   : > { %v1668_v57 = vpack.c.bf16 %v1667_v49, %v1667_v49 }
0x1480   : > { %v2975_v58 = vpop.eup %2974 }
0x1481   : > { %2815 = vmatmul.mubr.msk.bf16.vlgmr.msra.gmra.mrb[40].mxu1 %vm772_vm6, %v1668_v57  ;;  %v1779_v59 = vmul.f32 %v2975_v58, %v2971_v47 }
0x1482   : > { %2827 = vmatpush3.bf16.msra.mxu1 %v1670_v43  ;;  %2830 = vmatprep.mubr.msk.bf16.mxu1 %vm3001_vm0, %v3000_v3 }
0x1483   : > { %2828 = vmatprep.subr.bf16.mxu1 %v3000_v3  ;;  %v1780_v60 = vpack.c.bf16 %v1779_v59, %v1779_v59 }
0x1486   : > { %2829 = vmatpush3.bf16.msra.mxu1 %v1678_v53 }
0x1487   : > { %2834 = vmatprep.subr.bf16.mxu1 %v3000_v3 }
0x1489   : > { %2831 = vmatmul.mubr.msk.bf16.vlgmr.msra.gmra.mrb[44].mxu1 %vm772_vm6, %v1780_v60 }
0x148a   : > { %2836 = vmatprep.mubr.msk.bf16.mxu1 %vm3001_vm0, %v3000_v3  ;;  %2835 = vmatpush3.bf16.msra.mxu1 %v1830_v0 }
0x148b   : > { %2846 = vmatprep.subr.bf16.mxu1 %v3000_v3 }
0x1554   : > { %v1714_v1 = vpop.f32.mrb[40].mxu1 }
0x1555   : > { %v1720_v2 = vpack.c.bf16 %v1714_v1, %v1714_v1  ;;  %v2816_v4 = vpop.f32.mrb[41].mxu1 }
0x1556   : > { %v1717_v5 = vpop.f32.mrb[42].mxu1 }
0x1557   : > { %v2817_v7 = vpop.f32.mrb[43].mxu1  ;;  %2843 = vmatmul.mubr.msk.bf16.vlgmr.msra.gmra.mrb[40].mxu0 %vm714_vm4, %v1720_v2 }
0x1558   : > { %2858 = vmatprep.mubr.msk.bf16.mxu0 %vm3001_vm0, %v3000_v3 }
0x155c   : > { %v1818_v9 = vpop.f32.mrb[44].mxu1 }
0x155d   : > { %v1824_v28 = vpack.c.bf16 %v1818_v9, %v1818_v9  ;;  %v2832_v10 = vpop.f32.mrb[45].mxu1  ;;  %v2512_v9 = vld [vmem:[%s3672_s9 + $0x38] sm:$0xff] }
0x155e   : > { %v1821_v12 = vpop.f32.mrb[46].mxu1 }
0x155f   : > { %v2833_v14 = vpop.f32.mrb[47].mxu1  ;;  %2837 = vmatmul.mubr.msk.bf16.vlgmr.msra.gmra.mrb[48].mxu1 %vm714_vm4, %v1824_v28  ;;  %v2190_v28 = vpack.c.bf16 %v2512_v9, %v2512_v9  ;;  %v2552_v9 = vld [vmem:[%s3674_s11 + $0xf8] sm:$0xff] }
0x1560   : > { %2847 = vmatpush3.bf16.xpose.msra.mxu1 %v1928_v13  ;;  %2850 = vmatprep.mubr.msk.bf16.mxu1 %vm3001_vm0, %v3000_v3 }
0x1561   : > { %2848 = vmatprep.subr.bf16.mxu1 %v3000_v3  ;;  %v2195_v10 = vsel %vm793_vm7, %v2190_v28, 0 }
0x1568   : > { %2849 = vmatpush3.bf16.xpose.msra.mxu1 %v1931_v29 }
0x1569   : > { %2868 = vmatprep.subr.bf16.mxu1 %v3000_v3 }
0x156f   : > { %2851 = vmatmul.mubr.msk.bf16.vlgmr.msra.gmra.mrb[52].mxu1 %vm714_vm4, %v1919_v17 }
0x1570   : > { %2869 = vmatpush3.bf16.xpose.msra.mxu1 %v1928_v13  ;;  %2872 = vmatprep.mubr.msk.bf16.mxu1 %vm3001_vm0, %v3000_v3 }
0x1571   : > { %2870 = vmatprep.subr.bf16.mxu1 %v3000_v3 }
0x1578   : > { %2871 = vmatpush3.bf16.xpose.msra.mxu1 %v1931_v29 }
0x157f   : > { %2873 = vmatmul.mubr.msk.bf16.vlgmr.msra.gmra.mrb[56].mxu1 %vm714_vm4, %v2088_v19 }
0x1580   : > { %2305 = vmatprep.mubr.bf16.mxu1 %v3011_v6 }
0x162a   : > { %v1912_v20 = vpop.f32.mrb[40].mxu0 }
0x162b   : > { %v2844_v23 = vpop.f32.mrb[41].mxu0 }
0x162c   : > { %v1915_v18 = vpop.f32.mrb[42].mxu0 }
0x162d   : > { %v2845_v21 = vpop.f32.mrb[43].mxu0 }
0x1632   : > { %v1866_v22 = vpop.f32.mrb[48].mxu1 }
0x1633   : > { %v3520_v24 = vadd.f32 %v1912_v20, %v1866_v22  ;;  %v2838_v25 = vpop.f32.mrb[49].mxu1 }
0x1634   : > { %v1869_v26 = vpop.f32.mrb[50].mxu1 }
0x1635   : > { %v2839_v27 = vpop.f32.mrb[51].mxu1 }
0x1642   : > { %v1967_v30 = vpop.f32.mrb[52].mxu1 }
0x1643   : > { %v1973_v31 = vmul.f32 0.35355338, %v1967_v30  ;;  %v2852_v32 = vpop.f32.mrb[53].mxu1 }
0x1644   : > { %v1970_v33 = vpop.f32.mrb[54].mxu1  ;;  %v2528_v32 = vld [vmem:[%s3673_s10 + $0x48] sm:$0xff] }
0x1645   : > { %v2853_v34 = vpop.f32.mrb[55].mxu1  ;;  %v1974_v35 = vadd.f32 %v1973_v31, %v3219_v41  ;;  %v2530_v33 = vld [vmem:[%s3673_s10 + $0x58] sm:$0xff] }
0x1646   : > { %v2267_v34 = vpack.c.bf16 %v2530_v33, %v2528_v32 }
0x1647   : > { %v1975_v36 = vsel %vm772_vm6, %v1974_v35, -inf }
0x1648   : > { %1976 = vmax.xlane.f32.xlu0 %v1975_v36  ;;  %2273 = vmatprep.subr.bf16.mxu1 %v2267_v34 }
0x1652   : > { %v2126_v6 = vpop.f32.mrb[56].mxu1 }
0x1653   : > { %v2874_v37 = vpop.f32.mrb[57].mxu1  ;;  %v2132_v40 = vmul.f32 0.35355338, %v2126_v6  ;;  %v2532_v6 = vld [vmem:[%s3673_s10 + $0x68] sm:$0xff] }
0x1654   : > { %v2129_v38 = vpop.f32.mrb[58].mxu1  ;;  %v2534_v37 = vld [vmem:[%s3673_s10 + $0x78] sm:$0xff] }
0x1655   : > { %v2875_v39 = vpop.f32.mrb[59].mxu1  ;;  %v2133_v42 = vadd.f32 %v2132_v40, %v3219_v41  ;;  %v2531_v38 = vld [vmem:[%s3673_s10 + $0x60] sm:$0xff]  ;;  %v2533_v40 = vld [vmem:[%s3673_s10 + $0x70] sm:$0xff] }
0x1656   : > { %v2269_v39 = vpack.c.bf16 %v2534_v37, %v2532_v6 }
0x1657   : > { %v2134_v43 = vsel %vm772_vm6, %v2133_v42, -inf }
0x165e   : > { %1987 = vrot.lane.b32.xlu0 %v3446_v15, %s3681_s20 }
0x167d   : > { %2135 = vmax.xlane.f32.xlu0 %v2134_v43 }
0x16d5   : > { %v1977_v45 = vpop.xlane.xlu0 %1976 }
0x16d6   : > { %v1978_v46 = vsub.f32 %v1974_v35, %v1977_v45  ;;  %v2529_v35 = vld [vmem:[%s3673_s10 + $0x50] sm:$0xff] }
0x16d8   : > { %v1979_v47 = vmul.f32 1.442695, %v1978_v46 }
0x16d9   : > { %v1988_v48 = vpop.permute.xlu0 %1987 }
0x16da   : > { %2976 = vpow2.f32 %v1979_v47  ;;  %2855 = vmatpush3.bf16.msra.mxu0 %v1988_v48 }
0x16db   : > { %2856 = vmatprep.subr.bf16.mxu0 %v3000_v3 }
0x16e4   : > { %v2977_v50 = vpop.eup %2976 }
0x16e5   : > { %v1981_v51 = vsel %vm772_vm6, %v2977_v50, 0.0 }
0x16e6   : > { %1982 = vadd.xlane.f32.xlu1 %v1981_v51 }
0x16f7   : > { %1989 = vrot.lane.b32.xlu1 %v3442_v11, %s3681_s20  ;;  %v2511_v11 = vld [vmem:[%s3672_s9 + $0x30] sm:$0xff]  ;;  %s452_s20 = scalar_lea.vmem %s3676_s13, %s2475_s15 }
0x16f8   : > { %v2039_v59 = vpack.c.bf16 %v2511_v11, %v2511_v11  ;;  %v2542_v11 = vld [vmem:[%s3674_s11 + $0xa8] sm:$0xff] }
0x16fa   : > { %v2044_v62 = vsel %vm793_vm7, %v2039_v59, 0 }
0x170a   : > { %v2136_v15 = vpop.xlane.xlu0 %2135 }
0x170b   : > { %v2137_v41 = vsub.f32 %v2133_v42, %v2136_v15  ;;  %v2268_v42 = vpack.c.bf16 %v2533_v40, %v2531_v38 }
0x170d   : > { %v2138_v52 = vmul.f32 1.442695, %v2137_v41  ;;  %v2537_v41 = vld [vmem:[%s3674_s11 + $0x80] sm:$0xff] }
0x170f   : > { %2978 = vpow2.f32 %v2138_v52  ;;  %v2538_v52 = vld [vmem:[%s3674_s11 + $0x88] sm:$0xff] }
0x1719   : > { %v2979_v53 = vpop.eup %2978 }
0x171a   : > { %v2140_v54 = vsel %vm772_vm6, %v2979_v53, 0.0 }
0x171b   : > { %2141 = vadd.xlane.f32.xlu1 %v2140_v54  ;;  %v2539_v54 = vld [vmem:[%s3674_s11 + $0x90] sm:$0xff] }
0x1773   : > { %v1983_v49 = vpop.xlane.xlu1 %1982 }
0x1774   : > { %2980 = vrcp.f32 %v1983_v49  ;;  %v2540_v49 = vld [vmem:[%s3674_s11 + $0x98] sm:$0xff] }
0x1777   : > { %v1990_v57 = vpop.permute.xlu1 %1989 }
0x1778   : > { %v1996_v58 = vsel %vm793_vm7, %v1990_v57, 0  ;;  %v2341_v57 = vpack.c.bf16 %v2540_v49, %v2539_v54 }
0x1779   : > { %2857 = vmatpush3.bf16.msra.mxu0 %v1996_v58 }
0x177a   : > { %2862 = vmatprep.subr.bf16.mxu0 %v3000_v3 }
0x177e   : > { %v2981_v60 = vpop.eup %2980 }
0x177f   : > { %v1985_v61 = vmul.f32 %v2981_v60, %v2977_v50  ;;  %v2543_v60 = vld [vmem:[%s3674_s11 + $0xb0] sm:$0xff] }
0x1781   : > { %v1986_v44 = vpack.c.bf16 %v1985_v61, %v1985_v61  ;;  %v2544_v61 = vld [vmem:[%s3674_s11 + $0xb8] sm:$0xff] }
0x1783   : > { %2859 = vmatmul.mubr.msk.bf16.vlgmr.msra.gmra.mrb[44].mxu0 %vm772_vm6, %v1986_v44  ;;  %v2343_v44 = vpack.c.bf16 %v2544_v61, %v2543_v60 }
0x1784   : > { %2863 = vmatpush3.bf16.msra.mxu0 %v2044_v62  ;;  %2864 = vmatprep.mubr.msk.bf16.mxu0 %vm3001_vm0, %v3000_v3  ;;  %v2545_v62 = vld [vmem:[%s3674_s11 + $0xc0] sm:$0xff] }
0x1785   : > { %2876 = vmatprep.subr.bf16.mxu0 %v3000_v3 }
0x17a8   : > { %v2142_v56 = vpop.xlane.xlu1 %2141 }
0x17a9   : > { %2982 = vrcp.f32 %v2142_v56  ;;  %v2546_v56 = vld [vmem:[%s3674_s11 + $0xc8] sm:$0xff] }
0x17b3   : > { %v2983_v2 = vpop.eup %2982 }
0x17b4   : > { %v2144_v7 = vmul.f32 %v2983_v2, %v2979_v53  ;;  %v2340_v53 = vpack.c.bf16 %v2538_v52, %v2537_v41 }
0x17b6   : > { %v2145_v8 = vpack.c.bf16 %v2144_v7, %v2144_v7 }
0x1856   : > { %v2032_v63 = vpop.f32.mrb[44].mxu0 }
0x1857   : > { %v2038_v0 = vpack.c.bf16 %v2032_v63, %v2032_v63  ;;  %v2860_v1 = vpop.f32.mrb[45].mxu0  ;;  %v2344_v63 = vpack.c.bf16 %v2546_v56, %v2545_v62 }
0x1858   : > { %v2035_v4 = vpop.f32.mrb[46].mxu0  ;;  %v2548_v1 = vld [vmem:[%s3674_s11 + $0xd8] sm:$0xff] }
0x1859   : > { %v2861_v5 = vpop.f32.mrb[47].mxu0  ;;  %2865 = vmatmul.mubr.msk.bf16.vlgmr.msra.gmra.mrb[48].mxu0 %vm714_vm4, %v2038_v0  ;;  %v2547_v0 = vld [vmem:[%s3674_s11 + $0xd0] sm:$0xff]  ;;  %v2549_v4 = vld [vmem:[%s3674_s11 + $0xe0] sm:$0xff] }
0x185a   : > { %2877 = vmatpush3.bf16.msra.mxu0 %v1988_v48  ;;  %2880 = vmatprep.mubr.msk.bf16.mxu0 %vm3001_vm0, %v3000_v3  ;;  %v2526_v48 = vld [vmem:[%s3670_s7 + $0x1] ss:$0 sm:$0xff]  ;;  %v2345_v2 = vpack.c.bf16 %v2548_v1, %v2547_v0  ;;  %v2550_v5 = vld [vmem:[%s3674_s11 + $0xe8] sm:$0xff] }
0x185b   : > { %2878 = vmatprep.subr.bf16.mxu0 %v3000_v3  ;;  %v2346_v7 = vpack.c.bf16 %v2550_v5, %v2549_v4 }
0x185e   : > { %2879 = vmatpush3.bf16.msra.mxu0 %v1996_v58  ;;  %v2541_v58 = vld [vmem:[%s3674_s11 + $0xa0] sm:$0xff] }
0x185f   : > { %2884 = vmatprep.subr.bf16.mxu0 %v3000_v3  ;;  %v2342_v59 = vpack.c.bf16 %v2542_v11, %v2541_v58 }
0x1861   : > { %2881 = vmatmul.mubr.msk.bf16.vlgmr.msra.gmra.mrb[52].mxu0 %vm772_vm6, %v2145_v8  ;;  %v2551_v8 = vld [vmem:[%s3674_s11 + $0xf0] sm:$0xff] }
0x1862   : > { %2886 = vmatprep.mubr.msk.bf16.mxu0 %vm3001_vm0, %v3000_v3  ;;  %2885 = vmatpush3.bf16.msra.mxu0 %v2195_v10  ;;  %v2347_v28 = vpack.c.bf16 %v2552_v9, %v2551_v8 }
0x1863   : > { %2890 = vmatprep.subr.bf16.mxu0 %v3000_v3 }
0x192c   : > { %v2080_v12 = vpop.f32.mrb[48].mxu0 }
0x192d   : > { %v2086_v13 = vadd.f32 %v2080_v12, %v3520_v24  ;;  %v2866_v14 = vpop.f32.mrb[49].mxu0 }
0x192e   : > { %v2083_v16 = vpop.f32.mrb[50].mxu0 }
0x192f   : > { %v2867_v29 = vpop.f32.mrb[51].mxu0 }
0x1934   : > { %v2183_v17 = vpop.f32.mrb[52].mxu0 }
0x1935   : > { %v2189_v19 = vpack.c.bf16 %v2183_v17, %v2183_v17  ;;  %v2882_v20 = vpop.f32.mrb[53].mxu0 }
0x1936   : > { %v2186_v23 = vpop.f32.mrb[54].mxu0 }
0x1937   : > { %v2883_v18 = vpop.f32.mrb[55].mxu0  ;;  %2887 = vmatmul.mubr.msk.bf16.vlgmr.msra.gmra.mrb[56].mxu0 %vm714_vm4, %v2189_v19 }
0x1938   : > { %2906 = vmatprep.mubr.msk.bf16.mxu0 %vm3001_vm0, %v3000_v3  ;;  %2891 = vmatpush3.bf16.msra.mxu0 %v2340_v53 }
0x1939   : > { %2892 = vmatprep.subr.bf16.mxu0 %v3000_v3 }
0x193c   : > { %2893 = vmatpush3.bf16.msra.mxu0 %v2341_v57 }
0x193d   : > { %2894 = vmatprep.subr.bf16.mxu0 %v3000_v3 }
0x1940   : > { %2895 = vmatpush3.bf16.msra.mxu0 %v2342_v59 }
0x1941   : > { %2896 = vmatprep.subr.bf16.mxu0 %v3000_v3 }
0x1944   : > { %2897 = vmatpush3.bf16.msra.mxu0 %v2343_v44 }
0x1945   : > { %2898 = vmatprep.subr.bf16.mxu0 %v3000_v3 }
0x1948   : > { %2899 = vmatpush3.bf16.msra.mxu0 %v2344_v63 }
0x1949   : > { %2900 = vmatprep.subr.bf16.mxu0 %v3000_v3 }
0x194c   : > { %2901 = vmatpush3.bf16.msra.mxu0 %v2345_v2 }
0x194d   : > { %2902 = vmatprep.subr.bf16.mxu0 %v3000_v3 }
0x1950   : > { %2903 = vmatpush3.bf16.msra.mxu0 %v2346_v7 }
0x1951   : > { %2904 = vmatprep.subr.bf16.mxu0 %v3000_v3 }
0x1954   : > { %2905 = vmatpush3.bf16.msra.mxu0 %v2347_v28 }
0x1a0a   : > { %v2231_v21 = vpop.f32.mrb[56].mxu0 }
0x1a0b   : > { %v2237_v22 = vadd.f32 %v2231_v21, %v2086_v13  ;;  %v2888_v25 = vpop.f32.mrb[57].mxu0 }
0x1a0c   : > { %v2234_v26 = vpop.f32.mrb[58].mxu0 }
0x1a0d   : > { %v3561_v27 = vadd.f32 %v2237_v22, %v3417_v55  ;;  %v2889_v24 = vpop.f32.mrb[59].mxu0  ;;  %v2527_v55 = vld [vmem:[%s3673_s10 + $0x40] sm:$0xff] }
0x1a0e   : > { %v2266_v36 = vpack.c.bf16 %v2529_v35, %v2527_v55  ;;  %v2553_v55 = vld [vmem:[%s3675_s12] ss:$0 sm:$0xff] }
0x1a0f   : > { %v2241_v30 = vmul.f32 %v3561_v27, %v3561_v27 }
0x1a10   : > { %2274 = vmatpush1.bf16.msra.mxu1 %v2266_v36 }
0x1a11   : > { %v2242_v31 = vsel %vm599_vm3, %v2241_v30, 0.0  ;;  %2275 = vmatprep.subr.bf16.mxu1 %v2269_v39 }
0x1a12   : > { %2243 = vadd.xlane.f32.xlu0 %v2242_v31 }
0x1a14   : > { %2276 = vmatpush1.bf16.msra.mxu1 %v2268_v42 }
0x1a9f   : > { %v2244_v43 = vpop.xlane.xlu0 %2243 }
0x1aa0   : > { %v2245_v45 = vmul.f32 0.03125, %v2244_v43 }
0x1aa2   : > { %v2246_v46 = vadd.f32 1e-06, %v2245_v45 }
0x1aa4   : > { %2984 = vrsqrt.f32 %v2246_v46 }
0x1aae   : > { %v2985_v47 = vpop.eup %2984 }
0x1aaf   : > { %v2248_v50 = vmul.f32 %v2985_v47, %v3561_v27 }
0x1ab1   : > { %v2255_v51 = vmul.f32 %v2526_v48, %v2248_v50 }
0x1ab3   : > { %v2265_v15 = vpack.c.bf16 %v2255_v51, %v2255_v51 }
0x1ab5   : > { %2535 = vmatmul.mubr.msk.bf16.vlgmr.msra.gmra.mrb[60].mxu1 %vm599_vm3, %v2265_v15 }
0x1b88   : > { %v2307_v10 = vpop.f32.mrb[60].mxu1 }
0x1b89   : > { %v2536_v12 = vmul.f32 -1.442695, %v2307_v10  ;;  %v2309_v13 = vpop.f32.mrb[61].mxu1 }
0x1b8a   : > { %v2311_v14 = vpop.f32.mrb[62].mxu1 }
0x1b8b   : > { %2986 = vpow2.f32 %v2536_v12  ;;  %v2312_v16 = vpop.f32.mrb[63].mxu1 }
0x1b95   : > { %v2987_v29 = vpop.eup %2986 }
0x1b96   : > { %v2317_v17 = vadd.f32 1.0, %v2987_v29 }
0x1b98   : > { %2988 = vrcp.f32 %v2317_v17 }
0x1ba2   : > { %v2989_v3 = vpop.eup %2988 }
0x1ba3   : > { %v2320_v19 = vmul.f32 %v2989_v3, %v2307_v10 }
0x1ba5   : > { %v2321_v20 = vmul.f32 %v2320_v19, %v2309_v13 }
0x1ba7   : > { %v2339_v23 = vpack.c.bf16 %v2321_v20, %v2321_v20 }
0x1ba9   : > { %2907 = vmatmul.mubr.bf16.vlgmr.msra.gmra.mrb[60].mxu0 %v2339_v23 }
0x1c7c   : > { %v2382_v18 = vpop.f32.mrb[60].mxu0 }
0x1c7d   : > { %v2388_v21 = vadd.f32 %v2382_v18, %v3561_v27  ;;  %v2908_v22 = vpop.f32.mrb[61].mxu0 }
0x1c7e   : > { %v2385_v25 = vpop.f32.mrb[62].mxu0 }
0x1c7f   : > { %v2909_v26 = vpop.f32.mrb[63].mxu0  ;;  %v2390_v24 = vmul.f32 %v2388_v21, %v2388_v21 }
0x1c81   : > { %v2391_v30 = vsel %vm599_vm3, %v2390_v24, 0.0 }
0x1c82   : > { %2392 = vadd.xlane.f32.xlu0 %v2391_v30 }
0x1d0f   : > { %v2393_v31 = vpop.xlane.xlu0 %2392 }
0x1d10   : > { %v2394_v32 = vmul.f32 0.03125, %v2393_v31 }
0x1d12   : > { %v2395_v33 = vadd.f32 1e-06, %v2394_v32 }
0x1d14   : > { %2990 = vrsqrt.f32 %v2395_v33 }
0x1d1e   : > { %v2991_v34 = vpop.eup %2990 }
0x1d1f   : > { %v2397_v35 = vmul.f32 %v2991_v34, %v2388_v21 }
0x1d21   : > { %v2404_v27 = vmul.f32 %v2553_v55, %v2397_v35 }
0x1d23   : > { %2405 = vst.msk [vmem:[%s452_s20] sm:$0xff] %vm599_vm3, %v2404_v27 }
0x1d24 PF: > { %s23_s25 = sadd.s32 1, %s2998_s25  }
0x1d25   : > { %p20_p4 = scmp.ge.s32.totalorder %s23_s25, 4  }
0x1d27   :  { %22 = sbr.rel (!%p20_p4) target bundleno = 1 (0x1), region = 112 }

</bundles_post_ra>
